<compile_context>
chip_gen: v7x
topology: tpu7x:2x2x1
jax: 0.10.0
libtpu: 0.0.40
codegen_flags: <defaults>
</compile_context>

<pallas_src>
import jax
import jax.numpy as jnp
from jax.experimental import pallas as pl
from jax.experimental.pallas import tpu as pltpu

FEAT_DIM = 400          # real feature width (LayerNorm divisor)
PAD = 512               # lane-padded feature width (multiple of 128)
OUT_PAD = 128           # lane-dense combined logit width
LN_EPS = 1e-5

_PACKED_ORDER = ("w_bb", "b_bb", "w_sv", "b_sv", "w_int", "b_int", "w_mv", "b_mv")


def _round_up(n, m):
    return -(-n // m) * m


# ----------------------------------------------------------------------------
# Parameter initialization (raw, 400-dim, deterministic)
# ----------------------------------------------------------------------------
def init_params(key, in_channels):
    keys = iter(jax.random.split(key, 16))

    def lin(kk, fi, fo):
        kw, kb = jax.random.split(kk)
        w = jax.random.normal(kw, (fi, fo), jnp.float32) * 0.02
        b = jax.random.normal(kb, (fo,), jnp.float32) * 0.02
        return w, b

    def ln_affine(kk):
        kg, kb = jax.random.split(kk)
        g = 1.0 + 0.1 * jax.random.normal(kg, (FEAT_DIM,), jnp.float32)
        b = 0.05 * jax.random.normal(kb, (FEAT_DIM,), jnp.float32)
        return g, b

    params = {}
    # synthetic backbone: Linear(C -> 400) after global average pooling
    params["backbone_w"], params["backbone_b"] = lin(next(keys), in_channels, FEAT_DIM)

    def ln_head2(f_out):
        g, b = ln_affine(next(keys))
        w1, c1 = lin(next(keys), FEAT_DIM, FEAT_DIM)
        w2, c2 = lin(next(keys), FEAT_DIM, f_out)
        return dict(g=g, b=b, w1=w1, c1=c1, w2=w2, c2=c2)

    def ln_head1(f_out):
        g, b = ln_affine(next(keys))
        w1, c1 = lin(next(keys), FEAT_DIM, f_out)
        return dict(g=g, b=b, w1=w1, c1=c1)

    params["fc_offence"] = ln_head2(4)          # overwritten: LN->Linear(400,400)->Linear(400,4)
    params["fc_action"] = ln_head1(4)           # LN->Linear(400,4)
    params["inter"] = ln_head2(FEAT_DIM)        # LN->Linear(400,400)->Linear(400,400)
    params["fc_mv_actions"] = ln_head2(8)       # LN->Linear(400,400)->Linear(400,8)
    return params


# ----------------------------------------------------------------------------
# Host-side weight packing: LN folding, linear-pair composition (exact, f32),
# lane padding, bf16 cast.
# ----------------------------------------------------------------------------
def pack_params(params, spatial_size):
    f32 = jnp.float32

    def fold(g, b, w1, c1):
        # LN(x) @ W1 + c1 == xn @ (g*W1) + (c1 + b @ W1)   (xn = normalized x)
        return g[:, None] * w1, c1 + b @ w1

    def compose(p):
        # LN -> Linear -> Linear with no nonlinearity: compose into one affine.
        w1f, c1f = fold(p["g"], p["b"], p["w1"], p["c1"])
        return w1f @ p["w2"], c1f @ p["w2"] + p["c2"]

    off, act = params["fc_offence"], params["fc_action"]
    inter, mva = params["inter"], params["fc_mv_actions"]

    a_off, bias_off = compose(off)                                  # (400, 4)
    a_act, bias_act = fold(act["g"], act["b"], act["w1"], act["c1"])  # (400, 4)
    a_int, bias_int = compose(inter)                                # (400, 400)
    a_mva, bias_mva = compose(mva)                                  # (400, 8)

    # backbone: spatial mean pool folded into the contraction (W/S tiled over S)
    w_bb = jnp.repeat(params["backbone_w"] / float(spatial_size),
                      spatial_size, axis=0)                         # (C*S, 400)

    def pad2(w, rows, cols):
        return jnp.zeros((rows, cols), f32).at[:w.shape[0], :w.shape[1]].set(w)

    def padv(v, cols):
        return jnp.zeros((1, cols), f32).at[0, :v.shape[0]].set(v)

    # per-view combined head: offence -> cols 0:4, action -> cols 4:8
    w_sv = (jnp.zeros((PAD, OUT_PAD), f32)
            .at[:FEAT_DIM, 0:4].set(a_off)
            .at[:FEAT_DIM, 4:8].set(a_act))
    b_sv = (jnp.zeros((1, OUT_PAD), f32)
            .at[0, 0:4].set(bias_off).at[0, 4:8].set(bias_act))

    # multi-view combined head: offence -> cols 0:4, actions -> cols 4:12
    w_mv = (jnp.zeros((PAD, OUT_PAD), f32)
            .at[:FEAT_DIM, 0:4].set(a_off)
            .at[:FEAT_DIM, 4:12].set(a_mva))
    b_mv = (jnp.zeros((1, OUT_PAD), f32)
            .at[0, 0:4].set(bias_off).at[0, 4:12].set(bias_mva))

    bf = lambda a: a.astype(jnp.bfloat16)
    return dict(
        w_bb=bf(pad2(w_bb, w_bb.shape[0], PAD)),
        b_bb=padv(params["backbone_b"], PAD),
        w_sv=bf(w_sv), b_sv=b_sv,
        w_int=bf(pad2(a_int, PAD, PAD)), b_int=padv(bias_int, PAD),
        w_mv=bf(w_mv), b_mv=b_mv,
    )


# ----------------------------------------------------------------------------
# Forward pass: one gridless pallas_call, everything resident in VMEM once
# ----------------------------------------------------------------------------
@jax.jit
def xin_multimodal_net_n16_forward(packed, mvimages):
    B, V, C, D, H, W = mvimages.shape
    K = C * D * H * W
    M = B * V
    M_pad = max(8, _round_up(M, 8))        # sublane fill for MXU pushes / stores
    B_mv_pad = max(8, _round_up(B, 8))

    # zero-copy flatten of (B, V, C, D, H, W) -> (B*V, K); row index = b*V + v.
    x = mvimages.reshape(M, K)
    if M_pad != M:                          # tiny pad, only when B*V % 8 != 0
        x = jnp.pad(x, ((0, M_pad - M), (0, 0)))

    weights = [packed[name] for name in _PACKED_ORDER]

    def kernel(x_ref, w_bb, b_bb, w_sv, b_sv, w_int, b_int, w_mv, b_mv,
               sv_ref, mv_ref):
        lane = jax.lax.broadcasted_iota(jnp.int32, (1, PAD), 1)
        mask = lane < FEAT_DIM

        def normalize(t):
            # LayerNorm statistics over the real FEAT_DIM lanes only
            # (centered two-pass variance; padded lanes of the result are 0).
            tm = jnp.where(mask, t, 0.0)
            mu = jnp.sum(tm, axis=-1, keepdims=True) * (1.0 / FEAT_DIM)
            d = jnp.where(mask, t - mu, 0.0)
            var = jnp.sum(d * d, axis=-1, keepdims=True) * (1.0 / FEAT_DIM)
            return d * jax.lax.rsqrt(var + LN_EPS)

        # ---- backbone (mean pool folded into one real-K contraction) --------
        x_bf = x_ref[...].astype(jnp.bfloat16)                  # cast in-kernel
        feats = (jnp.dot(x_bf, w_bb[...], preferred_element_type=jnp.float32)
                 + b_bb[...])                                   # (M_pad, 512) f32

        # ---- per-view heads (all views at once, one lane-dense matmul) ------
        xn = normalize(feats).astype(jnp.bfloat16)
        sv_ref[...] = (jnp.dot(xn, w_sv[...],
                               preferred_element_type=jnp.float32) + b_sv[...])

        # ---- agr_type='max': element-wise max over the V views of each batch
        rows = [jnp.max(feats[b * V:(b + 1) * V, :], axis=0, keepdims=True)
                for b in range(B)]
        rows += [jnp.zeros((1, PAD), jnp.float32)] * (B_mv_pad - B)
        agg = jnp.concatenate(rows, axis=0)                     # (B_mv_pad, 512)

        # ---- multi-view path: inter (composed) then combined mv head --------
        xa = normalize(agg).astype(jnp.bfloat16)
        x_mv = (jnp.dot(xa, w_int[...], preferred_element_type=jnp.float32)
                + b_int[...])
        xm = normalize(x_mv).astype(jnp.bfloat16)
        mv_ref[...] = (jnp.dot(xm, w_mv[...],
                               preferred_element_type=jnp.float32) + b_mv[...])

    vmem_spec = pl.BlockSpec(memory_space=pltpu.MemorySpace.VMEM)
    sv_pad, mv_pad = pl.pallas_call(
        kernel,
        out_shape=(jax.ShapeDtypeStruct((M_pad, OUT_PAD), jnp.float32),
                   jax.ShapeDtypeStruct((B_mv_pad, OUT_PAD), jnp.float32)),
        in_specs=[vmem_spec] * (1 + len(weights)),
        out_specs=(vmem_spec, vmem_spec),
        compiler_params=pltpu.CompilerParams(
            vmem_limit_bytes=32 * 1024 * 1024),   # explicit, well above need
    )(x, *weights)

    sv = sv_pad[:M].reshape(B, V, OUT_PAD)        # row = b*V + v  ->  [b, v]
    mv = mv_pad[:B]
    return sv, mv


def build_output_dict(sv_out, mv_out, num_views):
    # tiny slices only; kept outside the kernel
    out = {"mv_collection": {
        "offence_logits": mv_out[:, 0:4],
        "action_logits": mv_out[:, 4:12],
    }}
    for i in range(num_views):
        out[f"single_{i}"] = {
            "offence_logits": sv_out[:, i, 0:4],
            "action_logits": sv_out[:, i, 4:8],
        }
    return out


# ----------------------------------------------------------------------------
# Pure-JAX f32 reference (for a loose numerical sanity check)
# ----------------------------------------------------------------------------
def _reference_forward(params, mvimages):
    B, V, C, D, H, W = mvimages.shape
    pooled = mvimages.reshape(B, V, C, -1).astype(jnp.float32).mean(-1)   # (B,V,C)
    feats = pooled @ params["backbone_w"] + params["backbone_b"]          # (B,V,400)

    def ln(x, g, b):
        mu = x.mean(-1, keepdims=True)
        var = ((x - mu) ** 2).mean(-1, keepdims=True)
        return (x - mu) / jnp.sqrt(var + LN_EPS) * g + b

    def head2(x, p):
        h = ln(x, p["g"], p["b"]) @ p["w1"] + p["c1"]
        return h @ p["w2"] + p["c2"]

    def head1(x, p):
        return ln(x, p["g"], p["b"]) @ p["w1"] + p["c1"]

    off = head2(feats, params["fc_offence"])
    act = head1(feats, params["fc_action"])
    agg = feats.max(axis=1)
    xm = head2(agg, params["inter"])
    return off, act, head2(xm, params["fc_offence"]), head2(xm, params["fc_mv_actions"])


def _assert_close(a, b, tol=7.5e-2):
    err = float(jnp.max(jnp.abs(a.astype(jnp.float32) - b.astype(jnp.float32))))
    assert err < tol, f"max abs err {err} >= {tol}"


# ----------------------------------------------------------------------------
if __name__ == "__main__":
    key = jax.random.PRNGKey(0)
    k_param, k_data = jax.random.split(key)

    B, V, C, D, H, W = 2, 2, 3, 4, 8, 8
    mvimages = jax.random.normal(k_data, (B, V, C, D, H, W), jnp.float32)

    params = init_params(k_param, in_channels=C)
    packed = pack_params(params, spatial_size=D * H * W)

    sv_out, mv_out = xin_multimodal_net_n16_forward(packed, mvimages)
    sv_out, mv_out = jax.block_until_ready((sv_out, mv_out))
    out = build_output_dict(sv_out, mv_out, V)

    # shape checks
    assert out["mv_collection"]["offence_logits"].shape == (B, 4)
    assert out["mv_collection"]["action_logits"].shape == (B, 8)
    for i in range(V):
        assert out[f"single_{i}"]["offence_logits"].shape == (B, 4)
        assert out[f"single_{i}"]["action_logits"].shape == (B, 4)

    # loose numerical check against the f32 pure-JAX reference (bf16 matmuls)
    ref_off, ref_act, ref_mv_off, ref_mv_act = _reference_forward(params, mvimages)
    for i in range(V):
        _assert_close(out[f"single_{i}"]["offence_logits"], ref_off[:, i])
        _assert_close(out[f"single_{i}"]["action_logits"], ref_act[:, i])
    _assert_close(out["mv_collection"]["offence_logits"], ref_mv_off)
    _assert_close(out["mv_collection"]["action_logits"], ref_mv_act)

    print("KERNEL_OK")
</pallas_src>

<mosaic_0001>
module attributes {stable_mosaic.version = 11 : i64} {
  func.func @kernel(%arg0: memref<8x768xf32, #tpu.memory_space<vmem>>, %arg1: memref<768x512xbf16, #tpu.memory_space<vmem>>, %arg2: memref<1x512xf32, #tpu.memory_space<vmem>>, %arg3: memref<512x128xbf16, #tpu.memory_space<vmem>>, %arg4: memref<1x128xf32, #tpu.memory_space<vmem>>, %arg5: memref<512x512xbf16, #tpu.memory_space<vmem>>, %arg6: memref<1x512xf32, #tpu.memory_space<vmem>>, %arg7: memref<512x128xbf16, #tpu.memory_space<vmem>>, %arg8: memref<1x128xf32, #tpu.memory_space<vmem>>, %arg9: memref<8x128xf32, #tpu.memory_space<vmem>>, %arg10: memref<8x128xf32, #tpu.memory_space<vmem>>) attributes {dimension_semantics = [], scalar_prefetch = 0 : i64, scratch_operands = 0 : i64, tpu.core_type = #tpu.core_type<tc>} {
    %0 = tpu.iota {dimensions = array<i32: 1>} : vector<1x512xi32>
    %c400_i32 = arith.constant 400 : i32
    %1 = vector.broadcast %c400_i32 : i32 to vector<1x512xi32>
    %2 = arith.cmpi slt, %0, %1 : vector<1x512xi32>
    %c0 = arith.constant 0 : index
    %c0_0 = arith.constant 0 : index
    %3 = vector.load %arg0[%c0, %c0_0] : memref<8x768xf32, #tpu.memory_space<vmem>>, vector<8x768xf32>
    %4 = arith.truncf %3 : vector<8x768xf32> to vector<8x768xbf16>
    %c0_1 = arith.constant 0 : index
    %c0_2 = arith.constant 0 : index
    %5 = vector.load %arg1[%c0_1, %c0_2] : memref<768x512xbf16, #tpu.memory_space<vmem>>, vector<768x512xbf16>
    %cst = arith.constant dense<0.000000e+00> : vector<8x512xf32>
    %6 = tpu.matmul %4, %5, %cst {dimension_numbers = #tpu.dot_dimension_numbers<[1], [0], [0], [1], [0, 0, 1, 1], [], []>} : vector<8x768xbf16>, vector<768x512xbf16>, vector<8x512xf32> -> vector<8x512xf32>
    %c0_3 = arith.constant 0 : index
    %c0_4 = arith.constant 0 : index
    %7 = vector.load %arg2[%c0_3, %c0_4] : memref<1x512xf32, #tpu.memory_space<vmem>>, vector<1x512xf32>
    %8 = vector.broadcast %7 : vector<1x512xf32> to vector<8x512xf32>
    %9 = arith.addf %6, %8 : vector<8x512xf32>
    %cst_5 = arith.constant 0.000000e+00 : f32
    %10 = vector.shape_cast %2 : vector<1x512xi1> to vector<1x512xi1>
    %11 = vector.broadcast %10 : vector<1x512xi1> to vector<8x512xi1>
    %12 = vector.broadcast %cst_5 : f32 to vector<8x512xf32>
    %13 = arith.select %11, %9, %12 : vector<8x512xi1>, vector<8x512xf32>
    %cst_6 = arith.constant dense<0.000000e+00> : vector<8xf32>
    %14 = vector.multi_reduction <add>, %13, %cst_6 [1] : vector<8x512xf32> to vector<8xf32>
    %15 = vector.shape_cast %14 : vector<8xf32> to vector<8x1xf32>
    %cst_7 = arith.constant 2.500000e-03 : f32
    %16 = vector.broadcast %cst_7 : f32 to vector<8x1xf32>
    %17 = arith.mulf %15, %16 : vector<8x1xf32>
    %18 = vector.broadcast %17 : vector<8x1xf32> to vector<8x512xf32>
    %19 = arith.subf %9, %18 : vector<8x512xf32>
    %cst_8 = arith.constant 0.000000e+00 : f32
    %20 = vector.shape_cast %2 : vector<1x512xi1> to vector<1x512xi1>
    %21 = vector.broadcast %20 : vector<1x512xi1> to vector<8x512xi1>
    %22 = vector.broadcast %cst_8 : f32 to vector<8x512xf32>
    %23 = arith.select %21, %19, %22 : vector<8x512xi1>, vector<8x512xf32>
    %24 = arith.mulf %23, %23 : vector<8x512xf32>
    %cst_9 = arith.constant dense<0.000000e+00> : vector<8xf32>
    %25 = vector.multi_reduction <add>, %24, %cst_9 [1] : vector<8x512xf32> to vector<8xf32>
    %26 = vector.shape_cast %25 : vector<8xf32> to vector<8x1xf32>
    %cst_10 = arith.constant 2.500000e-03 : f32
    %27 = vector.broadcast %cst_10 : f32 to vector<8x1xf32>
    %28 = arith.mulf %26, %27 : vector<8x1xf32>
    %cst_11 = arith.constant 9.99999974E-6 : f32
    %29 = vector.broadcast %cst_11 : f32 to vector<8x1xf32>
    %30 = arith.addf %28, %29 : vector<8x1xf32>
    %31 = math.rsqrt %30 : vector<8x1xf32>
    %32 = vector.broadcast %31 : vector<8x1xf32> to vector<8x512xf32>
    %33 = arith.mulf %23, %32 : vector<8x512xf32>
    %34 = arith.truncf %33 : vector<8x512xf32> to vector<8x512xbf16>
    %c0_12 = arith.constant 0 : index
    %c0_13 = arith.constant 0 : index
    %35 = vector.load %arg3[%c0_12, %c0_13] : memref<512x128xbf16, #tpu.memory_space<vmem>>, vector<512x128xbf16>
    %cst_14 = arith.constant dense<0.000000e+00> : vector<8x128xf32>
    %36 = tpu.matmul %34, %35, %cst_14 {dimension_numbers = #tpu.dot_dimension_numbers<[1], [0], [0], [1], [0, 0, 1, 1], [], []>} : vector<8x512xbf16>, vector<512x128xbf16>, vector<8x128xf32> -> vector<8x128xf32>
    %c0_15 = arith.constant 0 : index
    %c0_16 = arith.constant 0 : index
    %37 = vector.load %arg4[%c0_15, %c0_16] : memref<1x128xf32, #tpu.memory_space<vmem>>, vector<1x128xf32>
    %38 = vector.broadcast %37 : vector<1x128xf32> to vector<8x128xf32>
    %39 = arith.addf %36, %38 : vector<8x128xf32>
    %c0_17 = arith.constant 0 : index
    %c0_18 = arith.constant 0 : index
    %40 = vector.load %arg9[%c0_17, %c0_18] : memref<8x128xf32, #tpu.memory_space<vmem>>, vector<8x128xf32>
    tpu.vector_store %arg9[%c0_17, %c0_18], %39 {strides = array<i32>} : memref<8x128xf32, #tpu.memory_space<vmem>>, vector<8x128xf32>,
    %41 = vector.extract_strided_slice %9 {offsets = [0, 0], sizes = [2, 512], strides = [1, 1]} : vector<8x512xf32> to vector<2x512xf32>
    %cst_19 = arith.constant dense<0xFF800000> : vector<512xf32>
    %42 = vector.multi_reduction <maximumf>, %41, %cst_19 [0] : vector<2x512xf32> to vector<512xf32>
    %43 = vector.shape_cast %42 : vector<512xf32> to vector<1x512xf32>
    %44 = vector.extract_strided_slice %9 {offsets = [2, 0], sizes = [2, 512], strides = [1, 1]} : vector<8x512xf32> to vector<2x512xf32>
    %cst_20 = arith.constant dense<0xFF800000> : vector<512xf32>
    %45 = vector.multi_reduction <maximumf>, %44, %cst_20 [0] : vector<2x512xf32> to vector<512xf32>
    %46 = vector.shape_cast %45 : vector<512xf32> to vector<1x512xf32>
    %cst_21 = arith.constant 0.000000e+00 : f32
    %47 = vector.broadcast %cst_21 : f32 to vector<1x512xf32>
    %48 = tpu.concatenate %43, %46, %47, %47, %47, %47, %47, %47 in 0 : vector<1x512xf32>, vector<1x512xf32>, vector<1x512xf32>, vector<1x512xf32>, vector<1x512xf32>, vector<1x512xf32>, vector<1x512xf32>, vector<1x512xf32> -> vector<8x512xf32>
    %cst_22 = arith.constant 0.000000e+00 : f32
    %49 = vector.shape_cast %2 : vector<1x512xi1> to vector<1x512xi1>
    %50 = vector.broadcast %49 : vector<1x512xi1> to vector<8x512xi1>
    %51 = vector.broadcast %cst_22 : f32 to vector<8x512xf32>
    %52 = arith.select %50, %48, %51 : vector<8x512xi1>, vector<8x512xf32>
    %cst_23 = arith.constant dense<0.000000e+00> : vector<8xf32>
    %53 = vector.multi_reduction <add>, %52, %cst_23 [1] : vector<8x512xf32> to vector<8xf32>
    %54 = vector.shape_cast %53 : vector<8xf32> to vector<8x1xf32>
    %cst_24 = arith.constant 2.500000e-03 : f32
    %55 = vector.broadcast %cst_24 : f32 to vector<8x1xf32>
    %56 = arith.mulf %54, %55 : vector<8x1xf32>
    %57 = vector.broadcast %56 : vector<8x1xf32> to vector<8x512xf32>
    %58 = arith.subf %48, %57 : vector<8x512xf32>
    %cst_25 = arith.constant 0.000000e+00 : f32
    %59 = vector.shape_cast %2 : vector<1x512xi1> to vector<1x512xi1>
    %60 = vector.broadcast %59 : vector<1x512xi1> to vector<8x512xi1>
    %61 = vector.broadcast %cst_25 : f32 to vector<8x512xf32>
    %62 = arith.select %60, %58, %61 : vector<8x512xi1>, vector<8x512xf32>
    %63 = arith.mulf %62, %62 : vector<8x512xf32>
    %cst_26 = arith.constant dense<0.000000e+00> : vector<8xf32>
    %64 = vector.multi_reduction <add>, %63, %cst_26 [1] : vector<8x512xf32> to vector<8xf32>
    %65 = vector.shape_cast %64 : vector<8xf32> to vector<8x1xf32>
    %cst_27 = arith.constant 2.500000e-03 : f32
    %66 = vector.broadcast %cst_27 : f32 to vector<8x1xf32>
    %67 = arith.mulf %65, %66 : vector<8x1xf32>
    %cst_28 = arith.constant 9.99999974E-6 : f32
    %68 = vector.broadcast %cst_28 : f32 to vector<8x1xf32>
    %69 = arith.addf %67, %68 : vector<8x1xf32>
    %70 = math.rsqrt %69 : vector<8x1xf32>
    %71 = vector.broadcast %70 : vector<8x1xf32> to vector<8x512xf32>
    %72 = arith.mulf %62, %71 : vector<8x512xf32>
    %73 = arith.truncf %72 : vector<8x512xf32> to vector<8x512xbf16>
    %c0_29 = arith.constant 0 : index
    %c0_30 = arith.constant 0 : index
    %74 = vector.load %arg5[%c0_29, %c0_30] : memref<512x512xbf16, #tpu.memory_space<vmem>>, vector<512x512xbf16>
    %cst_31 = arith.constant dense<0.000000e+00> : vector<8x512xf32>
    %75 = tpu.matmul %73, %74, %cst_31 {dimension_numbers = #tpu.dot_dimension_numbers<[1], [0], [0], [1], [0, 0, 1, 1], [], []>} : vector<8x512xbf16>, vector<512x512xbf16>, vector<8x512xf32> -> vector<8x512xf32>
    %c0_32 = arith.constant 0 : index
    %c0_33 = arith.constant 0 : index
    %76 = vector.load %arg6[%c0_32, %c0_33] : memref<1x512xf32, #tpu.memory_space<vmem>>, vector<1x512xf32>
    %77 = vector.broadcast %76 : vector<1x512xf32> to vector<8x512xf32>
    %78 = arith.addf %75, %77 : vector<8x512xf32>
    %cst_34 = arith.constant 0.000000e+00 : f32
    %79 = vector.shape_cast %2 : vector<1x512xi1> to vector<1x512xi1>
    %80 = vector.broadcast %79 : vector<1x512xi1> to vector<8x512xi1>
    %81 = vector.broadcast %cst_34 : f32 to vector<8x512xf32>
    %82 = arith.select %80, %78, %81 : vector<8x512xi1>, vector<8x512xf32>
    %cst_35 = arith.constant dense<0.000000e+00> : vector<8xf32>
    %83 = vector.multi_reduction <add>, %82, %cst_35 [1] : vector<8x512xf32> to vector<8xf32>
    %84 = vector.shape_cast %83 : vector<8xf32> to vector<8x1xf32>
    %cst_36 = arith.constant 2.500000e-03 : f32
    %85 = vector.broadcast %cst_36 : f32 to vector<8x1xf32>
    %86 = arith.mulf %84, %85 : vector<8x1xf32>
    %87 = vector.broadcast %86 : vector<8x1xf32> to vector<8x512xf32>
    %88 = arith.subf %78, %87 : vector<8x512xf32>
    %cst_37 = arith.constant 0.000000e+00 : f32
    %89 = vector.shape_cast %2 : vector<1x512xi1> to vector<1x512xi1>
    %90 = vector.broadcast %89 : vector<1x512xi1> to vector<8x512xi1>
    %91 = vector.broadcast %cst_37 : f32 to vector<8x512xf32>
    %92 = arith.select %90, %88, %91 : vector<8x512xi1>, vector<8x512xf32>
    %93 = arith.mulf %92, %92 : vector<8x512xf32>
    %cst_38 = arith.constant dense<0.000000e+00> : vector<8xf32>
    %94 = vector.multi_reduction <add>, %93, %cst_38 [1] : vector<8x512xf32> to vector<8xf32>
    %95 = vector.shape_cast %94 : vector<8xf32> to vector<8x1xf32>
    %cst_39 = arith.constant 2.500000e-03 : f32
    %96 = vector.broadcast %cst_39 : f32 to vector<8x1xf32>
    %97 = arith.mulf %95, %96 : vector<8x1xf32>
    %cst_40 = arith.constant 9.99999974E-6 : f32
    %98 = vector.broadcast %cst_40 : f32 to vector<8x1xf32>
    %99 = arith.addf %97, %98 : vector<8x1xf32>
    %100 = math.rsqrt %99 : vector<8x1xf32>
    %101 = vector.broadcast %100 : vector<8x1xf32> to vector<8x512xf32>
    %102 = arith.mulf %92, %101 : vector<8x512xf32>
    %103 = arith.truncf %102 : vector<8x512xf32> to vector<8x512xbf16>
    %c0_41 = arith.constant 0 : index
    %c0_42 = arith.constant 0 : index
    %104 = vector.load %arg7[%c0_41, %c0_42] : memref<512x128xbf16, #tpu.memory_space<vmem>>, vector<512x128xbf16>
    %cst_43 = arith.constant dense<0.000000e+00> : vector<8x128xf32>
    %105 = tpu.matmul %103, %104, %cst_43 {dimension_numbers = #tpu.dot_dimension_numbers<[1], [0], [0], [1], [0, 0, 1, 1], [], []>} : vector<8x512xbf16>, vector<512x128xbf16>, vector<8x128xf32> -> vector<8x128xf32>
    %c0_44 = arith.constant 0 : index
    %c0_45 = arith.constant 0 : index
    %106 = vector.load %arg8[%c0_44, %c0_45] : memref<1x128xf32, #tpu.memory_space<vmem>>, vector<1x128xf32>
    %107 = vector.broadcast %106 : vector<1x128xf32> to vector<8x128xf32>
    %108 = arith.addf %105, %107 : vector<8x128xf32>
    %c0_46 = arith.constant 0 : index
    %c0_47 = arith.constant 0 : index
    %109 = vector.load %arg10[%c0_46, %c0_47] : memref<8x128xf32, #tpu.memory_space<vmem>>, vector<8x128xf32>
    tpu.vector_store %arg10[%c0_46, %c0_47], %108 {strides = array<i32>} : memref<8x128xf32, #tpu.memory_space<vmem>>, vector<8x128xf32>,
    return
  }
}

</mosaic_0001>

<bundles_post_ra>
// kernel: xin_multimodal_net_n16_forward.1
= control target key start
LH: loop header
LB: loop body
LE: loop exit
PB: predicated region body
PF: predicated region fallthrough
CT: control target
= control target key end

     0   :  { %16 = vsyncpa [#allocation3], 0  ;;  %s4896_s0 = inlined_call_operand.vmem [shape: f32[8,768], index: 0, kind: input, shape index: {}]   ;;  %s4897_s1 = inlined_call_operand.hbm [shape: bf16[768,512], index: 1, kind: input, shape index: {}]   ;;  %s4898_s2 = inlined_call_operand.vmem [shape: f32[1,512], index: 2, kind: input, shape index: {}]   ;;  %s4899_s3 = inlined_call_operand.vmem [shape: bf16[512,128], index: 3, kind: input, shape index: {}]   ;;  %s4900_s4 = inlined_call_operand.vmem [shape: f32[1,128], index: 4, kind: input, shape index: {}]   ;;  %s4901_s5 = inlined_call_operand.hbm [shape: bf16[512,512], index: 5, kind: input, shape index: {}]   ;;  %s4902_s6 = inlined_call_operand.vmem [shape: f32[1,512], index: 6, kind: input, shape index: {}]   ;;  %s4903_s7 = inlined_call_operand.hbm [shape: bf16[512,128], index: 7, kind: input, shape index: {}]   ;;  %s4904_s8 = inlined_call_operand.vmem [shape: f32[1,128], index: 8, kind: input, shape index: {}]   ;;  %s4905_s9 = inlined_call_operand.vmem [shape: f32[8,128], index: 9, kind: output, shape index: {0}]   ;;  %s4906_s10 = inlined_call_operand.vmem [shape: f32[8,128], index: 10, kind: output, shape index: {1}]  }
   0x1   :  { %17 = vsyncpa [#allocation5], 0  ;;  %s4516_s13 = smov [#allocation4]   ;;  %s4517_s15 = smov [#allocation2]  }
   0x2   :  { %s43_s14 = sshll.u32 %s4516_s13, 4  ;;  %s25_s16 = sshll.u32 %s4517_s15, 4  ;;  %s44_s14 = int_to_ptr.vmem [resolvable:$true] %s43_s14  ;;  %s4578_s16 = int_to_ptr.vmem [resolvable:$true] %s25_s16 }
   0x3   :  { %s4446_s19 = scalar_lea.hbm %s4901_s5, 16384 }
   0x4   :  { %p4447_p0 = scmp.ne.s32.totalorder %s4901_s5, %s4446_s19  ;;  %p4450_p1 = scmp.lt.u32.totalorder %s4446_s19, %s4901_s5 }
   0x6   :  { %p4452_p2 = pnand %p4450_p1, %p4447_p0 }
   0x8   :  { %4455 = shalt.err (!%p4452_p2)
}
   0x9   :  { %s4456_s24 = scalar_lea.vmem %s44_s14, 16384  ;;  %p4461_p4 = scmp.lt.s32.totalorder %s44_s14, %s44_s14 }
   0xa   :  { %p4457_p3 = scmp.ne.s32.totalorder %s44_s14, %s4456_s24  ;;  %p4462_p5 = scmp.lt.s32.totalorder %s4456_s24, %s4456_s24 }
   0xc   :  { %p4463_p6 = por %p4462_p5, %p4461_p4 }
   0xe   :  { %p4464_p7 = pnand %p4463_p6, %p4457_p3 }
  0x10   :  { %4467 = shalt.err (!%p4464_p7)
}
  0x11   :  { %s4518_s25 = smov 256   ;;  %s4519_s26 = smov 16  }
  0x12   :  { %49 = dma.hbm_to_vmem [thread:$0]  %s4901_s5, 16384, %s44_s14, [#allocation5], %s4518_s25, %s4518_s25, %s4519_s26  }
  0x13   :  { %s4468_s11 = scalar_lea.hbm %s4897_s1, 24576 }
  0x14   :  { %p4469_p8 = scmp.ne.s32.totalorder %s4897_s1, %s4468_s11  ;;  %p4472_p9 = scmp.lt.u32.totalorder %s4468_s11, %s4897_s1 }
  0x16   :  { %p4474_p10 = pnand %p4472_p9, %p4469_p8 }
  0x18   :  { %4477 = shalt.err (!%p4474_p10)
}
  0x19   :  { %s4478_s18 = scalar_lea.vmem %s4578_s16, 24576  ;;  %p4483_p12 = scmp.lt.s32.totalorder %s4578_s16, %s4578_s16 }
  0x1a   :  { %p4479_p11 = scmp.ne.s32.totalorder %s4578_s16, %s4478_s18  ;;  %p4484_p13 = scmp.lt.s32.totalorder %s4478_s18, %s4478_s18 }
  0x1c   :  { %p4485_p0 = por %p4484_p13, %p4483_p12 }
  0x1e   :  { %p4486_p1 = pnand %p4485_p0, %p4479_p11 }
  0x20   :  { %4489 = shalt.err (!%p4486_p1)
}
  0x21   :  { %31 = dma.hbm_to_vmem [thread:$0]  %s4897_s1, 24576, %s4578_s16, [#allocation3], %s4518_s25, %s4518_s25, %s4519_s26  }
  0x22   :  { %s4520_s19 = smov [#allocation6]   ;;  %s4490_s23 = scalar_lea.hbm %s4903_s7, 4096 }
  0x23   :  { %s57_s20 = sshll.u32 %s4520_s19, 4  ;;  %p4491_p2 = scmp.ne.s32.totalorder %s4903_s7, %s4490_s23  ;;  %s58_s20 = int_to_ptr.vmem [resolvable:$true] %s57_s20 }
  0x24   :  { %p4494_p3 = scmp.lt.u32.totalorder %s4490_s23, %s4903_s7 }
  0x26   :  { %p4496_p4 = pnand %p4494_p3, %p4491_p2 }
  0x28   :  { %4499 = shalt.err (!%p4496_p4)
}
  0x29   :  { %s4500_s30 = scalar_lea.vmem %s58_s20, 4096  ;;  %p4505_p6 = scmp.lt.s32.totalorder %s58_s20, %s58_s20 }
  0x2a   :  { %p4501_p5 = scmp.ne.s32.totalorder %s58_s20, %s4500_s30  ;;  %p4506_p7 = scmp.lt.s32.totalorder %s4500_s30, %s4500_s30 }
  0x2c   :  { %p4507_p8 = por %p4506_p7, %p4505_p6 }
  0x2e   :  { %p4508_p9 = pnand %p4507_p8, %p4501_p5 }
  0x30   :  { %4511 = shalt.err (!%p4508_p9)
}
  0x31   :  { %s4521_s1 = smov 64   ;;  %s4522_s16 = smov 4  }
  0x32   :  { %63 = dma.hbm_to_vmem [thread:$0]  %s4903_s7, 4096, %s58_s20, [#allocation5], %s4521_s1, %s4521_s1, %s4522_s16  }
  0x33   :  { %4512 = dma.done.wait [#allocation3], 24576  }
  0x34   :  { %4513 = vsyncadd [#allocation3], 4294942720 }
  0x35   :  { %4514 = dma.done.wait [#allocation5], 20480  }
  0x36   :  { %4515 = vsyncadd [#allocation5], 4294946816  ;;  %v3896_v0 = vld [vmem:[#allocation2 + $0x4] ss:$16 sps:$4 sm:$0xff]   ;;  %v3898_v1 = vld [vmem:[#allocation2 + $0xc] ss:$16 sps:$4 sm:$0xff]  }
  0x37   :  { %1271 = vmatprep.subr.bf16.mxu0 %v3896_v0  ;;  %v3900_v2 = vld [vmem:[#allocation2] ss:$16 sps:$4 sm:$0xff]   ;;  %v3901_v3 = vld [vmem:[#allocation2 + $0x8] ss:$16 sps:$4 sm:$0xff]   ;;  %1394 = vmatprep.subr.bf16.mxu1 %v3898_v1  ;;  %v3902_v4 = vld [vmem:[#allocation2 + $0x24] ss:$16 sps:$4 sm:$0xff]  }
  0x38   :  { %1272 = vmatpush1.bf16.msra.mxu0 %v3900_v2  ;;  %1395 = vmatpush1.bf16.msra.mxu1 %v3901_v3  ;;  %v3904_v5 = vld [vmem:[#allocation2 + $0x2c] ss:$16 sps:$4 sm:$0xff]   ;;  %v3906_v6 = vld [vmem:[#allocation2 + $0x20] ss:$16 sps:$4 sm:$0xff]   ;;  %v3907_v7 = vld [vmem:[#allocation2 + $0x28] ss:$16 sps:$4 sm:$0xff]  }
  0x39   :  { %1273 = vmatprep.subr.bf16.mxu0 %v3902_v4  ;;  %1396 = vmatprep.subr.bf16.mxu1 %v3904_v5  ;;  %v3908_v8 = vld [vmem:[#allocation2 + $0x44] ss:$16 sps:$4 sm:$0xff]   ;;  %v3910_v9 = vld [vmem:[#allocation2 + $0x4c] ss:$16 sps:$4 sm:$0xff]   ;;  %v3912_v10 = vld [vmem:[#allocation2 + $0x40] ss:$16 sps:$4 sm:$0xff]  }
  0x3a   :  { %v3913_v11 = vld [vmem:[#allocation2 + $0x48] ss:$16 sps:$4 sm:$0xff]   ;;  %v3914_v12 = vld [vmem:[#allocation2 + $0x64] ss:$16 sps:$4 sm:$0xff]   ;;  %v3916_v13 = vld [vmem:[#allocation2 + $0x6c] ss:$16 sps:$4 sm:$0xff]  }
  0x3b   :  { %v3918_v14 = vld [vmem:[#allocation2 + $0x60] ss:$16 sps:$4 sm:$0xff]   ;;  %v3919_v15 = vld [vmem:[#allocation2 + $0x68] ss:$16 sps:$4 sm:$0xff]   ;;  %v3920_v16 = vld [vmem:[#allocation2 + $0x84] ss:$16 sps:$4 sm:$0xff]  }
  0x3c   :  { %1274 = vmatpush1.bf16.msra.mxu0 %v3906_v6  ;;  %1397 = vmatpush1.bf16.msra.mxu1 %v3907_v7  ;;  %v3922_v17 = vld [vmem:[#allocation2 + $0x8c] ss:$16 sps:$4 sm:$0xff]   ;;  %v3924_v18 = vld [vmem:[#allocation2 + $0x80] ss:$16 sps:$4 sm:$0xff]   ;;  %v3925_v19 = vld [vmem:[#allocation2 + $0x88] ss:$16 sps:$4 sm:$0xff]  }
  0x3d   :  { %1275 = vmatprep.subr.bf16.mxu0 %v3908_v8  ;;  %1398 = vmatprep.subr.bf16.mxu1 %v3910_v9  ;;  %v3926_v20 = vld [vmem:[#allocation2 + $0xa4] ss:$16 sps:$4 sm:$0xff]   ;;  %v3928_v21 = vld [vmem:[#allocation2 + $0xac] ss:$16 sps:$4 sm:$0xff]   ;;  %v3930_v22 = vld [vmem:[#allocation2 + $0xa0] ss:$16 sps:$4 sm:$0xff]  }
  0x3e   :  { %v3931_v23 = vld [vmem:[#allocation2 + $0xa8] ss:$16 sps:$4 sm:$0xff]   ;;  %v3932_v24 = vld [vmem:[#allocation2 + $0xc4] ss:$16 sps:$4 sm:$0xff]   ;;  %v3934_v25 = vld [vmem:[#allocation2 + $0xcc] ss:$16 sps:$4 sm:$0xff]  }
  0x3f   :  { %v3936_v26 = vld [vmem:[#allocation2 + $0xc0] ss:$16 sps:$4 sm:$0xff]   ;;  %v3937_v27 = vld [vmem:[#allocation2 + $0xc8] ss:$16 sps:$4 sm:$0xff]   ;;  %v3938_v28 = vld [vmem:[#allocation2 + $0xe4] ss:$16 sps:$4 sm:$0xff]  }
  0x40   :  { %1276 = vmatpush1.bf16.msra.mxu0 %v3912_v10  ;;  %1399 = vmatpush1.bf16.msra.mxu1 %v3913_v11  ;;  %v3940_v29 = vld [vmem:[#allocation2 + $0xec] ss:$16 sps:$4 sm:$0xff]   ;;  %v3942_v30 = vld [vmem:[#allocation2 + $0xe0] ss:$16 sps:$4 sm:$0xff]   ;;  %v3943_v31 = vld [vmem:[#allocation2 + $0xe8] ss:$16 sps:$4 sm:$0xff]  }
  0x41   :  { %1277 = vmatprep.subr.bf16.mxu0 %v3914_v12  ;;  %1400 = vmatprep.subr.bf16.mxu1 %v3916_v13  ;;  %v3944_v32 = vld [vmem:[#allocation2 + $0x104] ss:$16 sps:$4 sm:$0xff]   ;;  %v3946_v33 = vld [vmem:[#allocation2 + $0x10c] ss:$16 sps:$4 sm:$0xff]   ;;  %v3948_v34 = vld [vmem:[#allocation2 + $0x100] ss:$16 sps:$4 sm:$0xff]  }
  0x42   :  { %v3949_v35 = vld [vmem:[#allocation2 + $0x108] ss:$16 sps:$4 sm:$0xff]   ;;  %v3950_v36 = vld [vmem:[#allocation2 + $0x124] ss:$16 sps:$4 sm:$0xff]   ;;  %v3952_v37 = vld [vmem:[#allocation2 + $0x12c] ss:$16 sps:$4 sm:$0xff]  }
  0x43   :  { %v3954_v38 = vld [vmem:[#allocation2 + $0x120] ss:$16 sps:$4 sm:$0xff]   ;;  %v3955_v39 = vld [vmem:[#allocation2 + $0x128] ss:$16 sps:$4 sm:$0xff]   ;;  %v3956_v40 = vld [vmem:[#allocation2 + $0x144] ss:$16 sps:$4 sm:$0xff]  }
  0x44   :  { %1278 = vmatpush1.bf16.msra.mxu0 %v3918_v14  ;;  %1401 = vmatpush1.bf16.msra.mxu1 %v3919_v15  ;;  %v3958_v41 = vld [vmem:[#allocation2 + $0x14c] ss:$16 sps:$4 sm:$0xff]   ;;  %v3960_v42 = vld [vmem:[#allocation2 + $0x140] ss:$16 sps:$4 sm:$0xff]   ;;  %v3961_v43 = vld [vmem:[#allocation2 + $0x148] ss:$16 sps:$4 sm:$0xff]  }
  0x45   :  { %1279 = vmatprep.subr.bf16.mxu0 %v3920_v16  ;;  %1402 = vmatprep.subr.bf16.mxu1 %v3922_v17  ;;  %v3962_v44 = vld [vmem:[#allocation2 + $0x164] ss:$16 sps:$4 sm:$0xff]   ;;  %v3964_v45 = vld [vmem:[#allocation2 + $0x16c] ss:$16 sps:$4 sm:$0xff]   ;;  %v3966_v47 = vld [vmem:[#allocation2 + $0x160] ss:$16 sps:$4 sm:$0xff]  }
  0x46   :  { %v86_v46 = vld [vmem:[%s4896_s0 + $0x8] sm:$0xff]  ;;  %v3968_v50 = vld [vmem:[#allocation2 + $0x184] ss:$16 sps:$4 sm:$0xff]   ;;  %v3972_v52 = vld [vmem:[#allocation2 + $0x180] ss:$16 sps:$4 sm:$0xff]   ;;  %vm1907_vm0 = vcmask 1041408  }
  0x47   :  { %v92_v48 = vpack.c.bf16 %v86_v46, %v86_v46  ;;  %v3967_v49 = vld [vmem:[#allocation2 + $0x168] ss:$16 sps:$4 sm:$0xff]   ;;  %v3970_v51 = vld [vmem:[#allocation2 + $0x18c] ss:$16 sps:$4 sm:$0xff]   ;;  %v3974_v54 = vld [vmem:[#allocation2 + $0x1a4] ss:$16 sps:$4 sm:$0xff]  }
  0x48   :  { %1280 = vmatpush1.bf16.msra.mxu0 %v3924_v18  ;;  %1403 = vmatpush1.bf16.msra.mxu1 %v3925_v19  ;;  %v3973_v53 = vld [vmem:[#allocation2 + $0x188] ss:$16 sps:$4 sm:$0xff]   ;;  %v3976_v55 = vld [vmem:[#allocation2 + $0x1ac] ss:$16 sps:$4 sm:$0xff]   ;;  %v3978_v56 = vld [vmem:[#allocation2 + $0x1a0] ss:$16 sps:$4 sm:$0xff]  }
  0x49   :  { %1281 = vmatprep.subr.bf16.mxu0 %v3926_v20  ;;  %1404 = vmatprep.subr.bf16.mxu1 %v3928_v21  ;;  %v3979_v57 = vld [vmem:[#allocation2 + $0x1a8] ss:$16 sps:$4 sm:$0xff]   ;;  %v3980_v58 = vld [vmem:[#allocation2 + $0x1c4] ss:$16 sps:$4 sm:$0xff]   ;;  %v3982_v59 = vld [vmem:[#allocation2 + $0x1cc] ss:$16 sps:$4 sm:$0xff]  }
  0x4a   :  { %1303 = vmatprep.mubr.bf16.mxu0 %v92_v48  ;;  %1426 = vmatprep.mubr.bf16.mxu1 %v92_v48  ;;  %v3984_v60 = vld [vmem:[#allocation2 + $0x1c0] ss:$16 sps:$4 sm:$0xff]   ;;  %v3985_v61 = vld [vmem:[#allocation2 + $0x1c8] ss:$16 sps:$4 sm:$0xff]   ;;  %v3986_v62 = vld [vmem:[#allocation2 + $0x1e4] ss:$16 sps:$4 sm:$0xff]  }
  0x4b   :  { %v3988_v63 = vld [vmem:[#allocation2 + $0x1ec] ss:$16 sps:$4 sm:$0xff]   ;;  %v3990_v0 = vld [vmem:[#allocation2 + $0x1e0] ss:$16 sps:$4 sm:$0xff]   ;;  %v3991_v1 = vld [vmem:[#allocation2 + $0x1e8] ss:$16 sps:$4 sm:$0xff]  }
  0x4c   :  { %1282 = vmatpush1.bf16.msra.mxu0 %v3930_v22  ;;  %1405 = vmatpush1.bf16.msra.mxu1 %v3931_v23  ;;  %v85_v2 = vld [vmem:[%s4896_s0] sm:$0xff]  ;;  %v3997_v4 = vld [vmem:[#allocation2 + $0x20c] ss:$16 sps:$4 sm:$0xff]   ;;  %v3995_v7 = vld [vmem:[#allocation2 + $0x208] ss:$16 sps:$4 sm:$0xff]   ;;  %vm1936_vm1 = vcmask 1043458  }
  0x4d   :  { %1283 = vmatprep.subr.bf16.mxu0 %v3932_v24  ;;  %1406 = vmatprep.subr.bf16.mxu1 %v3934_v25  ;;  %v3994_v3 = vld [vmem:[#allocation2 + $0x204] ss:$16 sps:$4 sm:$0xff]   ;;  %v91_v5 = vpack.c.bf16 %v85_v2, %v85_v2  ;;  %v3992_v6 = vld [vmem:[#allocation2 + $0x200] ss:$16 sps:$4 sm:$0xff]   ;;  %v4003_v9 = vld [vmem:[#allocation2 + $0x22c] ss:$16 sps:$4 sm:$0xff]  }
  0x4e   :  { %v4000_v8 = vld [vmem:[#allocation2 + $0x224] ss:$16 sps:$4 sm:$0xff]   ;;  %v3998_v10 = vld [vmem:[#allocation2 + $0x220] ss:$16 sps:$4 sm:$0xff]   ;;  %v4001_v11 = vld [vmem:[#allocation2 + $0x228] ss:$16 sps:$4 sm:$0xff]  }
  0x4f   :  { %v4006_v12 = vld [vmem:[#allocation2 + $0x244] ss:$16 sps:$4 sm:$0xff]   ;;  %v4009_v13 = vld [vmem:[#allocation2 + $0x24c] ss:$16 sps:$4 sm:$0xff]   ;;  %v4004_v14 = vld [vmem:[#allocation2 + $0x240] ss:$16 sps:$4 sm:$0xff]  }
  0x50   :  { %1284 = vmatpush1.bf16.msra.mxu0 %v3936_v26  ;;  %1407 = vmatpush1.bf16.msra.mxu1 %v3937_v27  ;;  %v4007_v15 = vld [vmem:[#allocation2 + $0x248] ss:$16 sps:$4 sm:$0xff]   ;;  %v4012_v16 = vld [vmem:[#allocation2 + $0x264] ss:$16 sps:$4 sm:$0xff]   ;;  %v4015_v17 = vld [vmem:[#allocation2 + $0x26c] ss:$16 sps:$4 sm:$0xff]  }
  0x51   :  { %1285 = vmatprep.subr.bf16.mxu0 %v3938_v28  ;;  %1408 = vmatprep.subr.bf16.mxu1 %v3940_v29  ;;  %v4010_v18 = vld [vmem:[#allocation2 + $0x260] ss:$16 sps:$4 sm:$0xff]   ;;  %v4013_v19 = vld [vmem:[#allocation2 + $0x268] ss:$16 sps:$4 sm:$0xff]   ;;  %v4018_v20 = vld [vmem:[#allocation2 + $0x284] ss:$16 sps:$4 sm:$0xff]  }
  0x52   :  { %v4021_v21 = vld [vmem:[#allocation2 + $0x28c] ss:$16 sps:$4 sm:$0xff]   ;;  %v4016_v22 = vld [vmem:[#allocation2 + $0x280] ss:$16 sps:$4 sm:$0xff]   ;;  %v4019_v23 = vld [vmem:[#allocation2 + $0x288] ss:$16 sps:$4 sm:$0xff]  }
  0x53   :  { %v4024_v24 = vld [vmem:[#allocation2 + $0x2a4] ss:$16 sps:$4 sm:$0xff]   ;;  %v4027_v25 = vld [vmem:[#allocation2 + $0x2ac] ss:$16 sps:$4 sm:$0xff]   ;;  %v4022_v26 = vld [vmem:[#allocation2 + $0x2a0] ss:$16 sps:$4 sm:$0xff]  }
  0x54   :  { %1286 = vmatpush1.bf16.msra.mxu0 %v3942_v30  ;;  %1409 = vmatpush1.bf16.msra.mxu1 %v3943_v31  ;;  %v4025_v27 = vld [vmem:[#allocation2 + $0x2a8] ss:$16 sps:$4 sm:$0xff]   ;;  %v4030_v28 = vld [vmem:[#allocation2 + $0x2c4] ss:$16 sps:$4 sm:$0xff]   ;;  %v4033_v29 = vld [vmem:[#allocation2 + $0x2cc] ss:$16 sps:$4 sm:$0xff]  }
  0x55   :  { %1287 = vmatprep.subr.bf16.mxu0 %v3944_v32  ;;  %1410 = vmatprep.subr.bf16.mxu1 %v3946_v33  ;;  %v88_v30 = vld [vmem:[%s4896_s0 + $0x18] sm:$0xff]  ;;  %v4028_v31 = vld [vmem:[#allocation2 + $0x2c0] ss:$16 sps:$4 sm:$0xff]   ;;  %v4054_v46 = vld [vmem:[#allocation2 + $0x344] ss:$16 sps:$4 sm:$0xff]   ;;  %vm1965_vm2 = vcmask 1040384  }
  0x56   :  { %v94_v32 = vpack.c.bf16 %v88_v30, %v88_v30  ;;  %v4031_v33 = vld [vmem:[#allocation2 + $0x2c8] ss:$16 sps:$4 sm:$0xff]   ;;  %v4052_v48 = vld [vmem:[#allocation2 + $0x340] ss:$16 sps:$4 sm:$0xff]   ;;  %v4084_v2 = vld [vmem:[#allocation2 + $0x3e4] ss:$16 sps:$4 sm:$0xff]  }
  0x57   :  { %v4120_v30 = vld [vmem:[#allocation2 + $0x4a4] ss:$16 sps:$4 sm:$0xff]   ;;  %vm1974_vm4 = vcmask 1042432   ;;  %vm1979_vm5 = vcmask 1043456   ;;  %vm1984_vm6 = vcmask 1044480   ;;  %vm1989_vm7 = vcmask 1045504  }
  0x58   :  { %1288 = vmatpush1.bf16.msra.mxu0 %v3948_v34  ;;  %1411 = vmatpush1.bf16.msra.mxu1 %v3949_v35  ;;  %v4036_v34 = vld [vmem:[#allocation2 + $0x2e4] ss:$16 sps:$4 sm:$0xff]   ;;  %v4039_v35 = vld [vmem:[#allocation2 + $0x2ec] ss:$16 sps:$4 sm:$0xff]   ;;  %vm1994_vm8 = vcmask 1046528  }
  0x59   :  { %1289 = vmatprep.subr.bf16.mxu0 %v3950_v36  ;;  %1412 = vmatprep.subr.bf16.mxu1 %v3952_v37  ;;  %v4034_v36 = vld [vmem:[#allocation2 + $0x2e0] ss:$16 sps:$4 sm:$0xff]   ;;  %v4037_v37 = vld [vmem:[#allocation2 + $0x2e8] ss:$16 sps:$4 sm:$0xff]  }
  0x5c   :  { %1290 = vmatpush1.bf16.msra.mxu0 %v3954_v38  ;;  %1413 = vmatpush1.bf16.msra.mxu1 %v3955_v39  ;;  %v4042_v38 = vld [vmem:[#allocation2 + $0x304] ss:$16 sps:$4 sm:$0xff]   ;;  %v4045_v39 = vld [vmem:[#allocation2 + $0x30c] ss:$16 sps:$4 sm:$0xff]  }
  0x5d   :  { %1291 = vmatprep.subr.bf16.mxu0 %v3956_v40  ;;  %1414 = vmatprep.subr.bf16.mxu1 %v3958_v41  ;;  %v4040_v40 = vld [vmem:[#allocation2 + $0x300] ss:$16 sps:$4 sm:$0xff]   ;;  %v4043_v41 = vld [vmem:[#allocation2 + $0x308] ss:$16 sps:$4 sm:$0xff]  }
  0x60   :  { %1292 = vmatpush1.bf16.msra.mxu0 %v3960_v42  ;;  %1415 = vmatpush1.bf16.msra.mxu1 %v3961_v43  ;;  %v4048_v42 = vld [vmem:[#allocation2 + $0x324] ss:$16 sps:$4 sm:$0xff]   ;;  %v4051_v43 = vld [vmem:[#allocation2 + $0x32c] ss:$16 sps:$4 sm:$0xff]  }
  0x61   :  { %1293 = vmatprep.subr.bf16.mxu0 %v3962_v44  ;;  %1416 = vmatprep.subr.bf16.mxu1 %v3964_v45  ;;  %v4046_v44 = vld [vmem:[#allocation2 + $0x320] ss:$16 sps:$4 sm:$0xff]   ;;  %v4049_v45 = vld [vmem:[#allocation2 + $0x328] ss:$16 sps:$4 sm:$0xff]  }
  0x64   :  { %1294 = vmatpush1.bf16.msra.mxu0 %v3966_v47  ;;  %1417 = vmatpush1.bf16.msra.mxu1 %v3967_v49  ;;  %v4057_v47 = vld [vmem:[#allocation2 + $0x34c] ss:$16 sps:$4 sm:$0xff]   ;;  %v4055_v49 = vld [vmem:[#allocation2 + $0x348] ss:$16 sps:$4 sm:$0xff]  }
  0x65   :  { %1295 = vmatprep.subr.bf16.mxu0 %v3968_v50  ;;  %1418 = vmatprep.subr.bf16.mxu1 %v3970_v51  ;;  %v4060_v50 = vld [vmem:[#allocation2 + $0x364] ss:$16 sps:$4 sm:$0xff]   ;;  %v4063_v51 = vld [vmem:[#allocation2 + $0x36c] ss:$16 sps:$4 sm:$0xff]  }
  0x68   :  { %1296 = vmatpush1.bf16.msra.mxu0 %v3972_v52  ;;  %1419 = vmatpush1.bf16.msra.mxu1 %v3973_v53  ;;  %v4058_v52 = vld [vmem:[#allocation2 + $0x360] ss:$16 sps:$4 sm:$0xff]   ;;  %v4061_v53 = vld [vmem:[#allocation2 + $0x368] ss:$16 sps:$4 sm:$0xff]  }
  0x69   :  { %1297 = vmatprep.subr.bf16.mxu0 %v3974_v54  ;;  %1420 = vmatprep.subr.bf16.mxu1 %v3976_v55  ;;  %v4066_v54 = vld [vmem:[#allocation2 + $0x384] ss:$16 sps:$4 sm:$0xff]   ;;  %v4069_v55 = vld [vmem:[#allocation2 + $0x38c] ss:$16 sps:$4 sm:$0xff]  }
  0x6c   :  { %1298 = vmatpush1.bf16.msra.mxu0 %v3978_v56  ;;  %1421 = vmatpush1.bf16.msra.mxu1 %v3979_v57  ;;  %v4064_v56 = vld [vmem:[#allocation2 + $0x380] ss:$16 sps:$4 sm:$0xff]   ;;  %v4067_v57 = vld [vmem:[#allocation2 + $0x388] ss:$16 sps:$4 sm:$0xff]  }
  0x6d   :  { %1299 = vmatprep.subr.bf16.mxu0 %v3980_v58  ;;  %1422 = vmatprep.subr.bf16.mxu1 %v3982_v59  ;;  %v4072_v58 = vld [vmem:[#allocation2 + $0x3a4] ss:$16 sps:$4 sm:$0xff]   ;;  %v4075_v59 = vld [vmem:[#allocation2 + $0x3ac] ss:$16 sps:$4 sm:$0xff]  }
  0x70   :  { %1300 = vmatpush1.bf16.msra.mxu0 %v3984_v60  ;;  %1423 = vmatpush1.bf16.msra.mxu1 %v3985_v61  ;;  %v4070_v60 = vld [vmem:[#allocation2 + $0x3a0] ss:$16 sps:$4 sm:$0xff]   ;;  %v4073_v61 = vld [vmem:[#allocation2 + $0x3a8] ss:$16 sps:$4 sm:$0xff]  }
  0x71   :  { %1301 = vmatprep.subr.bf16.mxu0 %v3986_v62  ;;  %1424 = vmatprep.subr.bf16.mxu1 %v3988_v63  ;;  %v4078_v62 = vld [vmem:[#allocation2 + $0x3c4] ss:$16 sps:$4 sm:$0xff]   ;;  %v4081_v63 = vld [vmem:[#allocation2 + $0x3cc] ss:$16 sps:$4 sm:$0xff]  }
  0x74   :  { %1302 = vmatpush1.bf16.msra.mxu0 %v3990_v0  ;;  %1425 = vmatpush1.bf16.msra.mxu1 %v3991_v1  ;;  %v4076_v0 = vld [vmem:[#allocation2 + $0x3c0] ss:$16 sps:$4 sm:$0xff]   ;;  %v4079_v1 = vld [vmem:[#allocation2 + $0x3c8] ss:$16 sps:$4 sm:$0xff]  }
  0x75   :  { %1312 = vmatprep.subr.bf16.mxu0 %v3994_v3  ;;  %1435 = vmatprep.subr.bf16.mxu1 %v3997_v4  ;;  %v4087_v3 = vld [vmem:[#allocation2 + $0x3ec] ss:$16 sps:$4 sm:$0xff]   ;;  %v4082_v4 = vld [vmem:[#allocation2 + $0x3e0] ss:$16 sps:$4 sm:$0xff]  }
  0x77   :  { %1304 = vmatmul.mubr.bf16.vlgmr.msra.gmra.mrb[0].mxu0 %v91_v5  ;;  %1427 = vmatmul.mubr.bf16.vlgmr.msra.gmra.mrb[0].mxu1 %v91_v5  ;;  %v4085_v5 = vld [vmem:[#allocation2 + $0x3e8] ss:$16 sps:$4 sm:$0xff]  }
  0x78   :  { %1313 = vmatpush1.bf16.msra.mxu0 %v3992_v6  ;;  %1436 = vmatpush1.bf16.msra.mxu1 %v3995_v7  ;;  %v4090_v6 = vld [vmem:[#allocation2 + $0x404] ss:$16 sps:$4 sm:$0xff]  }
  0x79   :  { %1314 = vmatprep.subr.bf16.mxu0 %v4000_v8  ;;  %1437 = vmatprep.subr.bf16.mxu1 %v4003_v9  ;;  %v87_v7 = vld [vmem:[%s4896_s0 + $0x10] sm:$0xff]  ;;  %v4093_v8 = vld [vmem:[#allocation2 + $0x40c] ss:$16 sps:$4 sm:$0xff]  }
  0x7a   :  { %1344 = vmatprep.mubr.bf16.mxu0 %v94_v32  ;;  %1467 = vmatprep.mubr.bf16.mxu1 %v94_v32  ;;  %v4088_v9 = vld [vmem:[#allocation2 + $0x400] ss:$16 sps:$4 sm:$0xff]  }
  0x7b   :  { %v4118_v32 = vld [vmem:[#allocation2 + $0x4a0] ss:$16 sps:$4 sm:$0xff]  }
  0x7c   :  { %1315 = vmatpush1.bf16.msra.mxu0 %v3998_v10  ;;  %1438 = vmatpush1.bf16.msra.mxu1 %v4001_v11  ;;  %v93_v10 = vpack.c.bf16 %v87_v7, %v87_v7  ;;  %v4091_v11 = vld [vmem:[#allocation2 + $0x408] ss:$16 sps:$4 sm:$0xff]   ;;  %v4183_v7 = vld [vmem:[#allocation2 + $0x5ec] ss:$16 sps:$4 sm:$0xff]  }
  0x7d   :  { %1316 = vmatprep.subr.bf16.mxu0 %v4006_v12  ;;  %1439 = vmatprep.subr.bf16.mxu1 %v4009_v13  ;;  %v4096_v12 = vld [vmem:[#allocation2 + $0x424] ss:$16 sps:$4 sm:$0xff]   ;;  %v4099_v13 = vld [vmem:[#allocation2 + $0x42c] ss:$16 sps:$4 sm:$0xff]  }
  0x80   :  { %1317 = vmatpush1.bf16.msra.mxu0 %v4004_v14  ;;  %1440 = vmatpush1.bf16.msra.mxu1 %v4007_v15  ;;  %v90_v14 = vld [vmem:[%s4896_s0 + $0x28] sm:$0xff]  ;;  %v4094_v15 = vld [vmem:[#allocation2 + $0x420] ss:$16 sps:$4 sm:$0xff]  }
  0x81   :  { %1318 = vmatprep.subr.bf16.mxu0 %v4012_v16  ;;  %1441 = vmatprep.subr.bf16.mxu1 %v4015_v17  ;;  %v4097_v16 = vld [vmem:[#allocation2 + $0x428] ss:$16 sps:$4 sm:$0xff]   ;;  %v96_v17 = vpack.c.bf16 %v90_v14, %v90_v14 }
  0x84   :  { %1319 = vmatpush1.bf16.msra.mxu0 %v4010_v18  ;;  %1442 = vmatpush1.bf16.msra.mxu1 %v4013_v19  ;;  %v4102_v18 = vld [vmem:[#allocation2 + $0x444] ss:$16 sps:$4 sm:$0xff]   ;;  %v4105_v19 = vld [vmem:[#allocation2 + $0x44c] ss:$16 sps:$4 sm:$0xff]  }
  0x85   :  { %1320 = vmatprep.subr.bf16.mxu0 %v4018_v20  ;;  %1443 = vmatprep.subr.bf16.mxu1 %v4021_v21  ;;  %v4100_v20 = vld [vmem:[#allocation2 + $0x440] ss:$16 sps:$4 sm:$0xff]   ;;  %v4103_v21 = vld [vmem:[#allocation2 + $0x448] ss:$16 sps:$4 sm:$0xff]  }
  0x88   :  { %1321 = vmatpush1.bf16.msra.mxu0 %v4016_v22  ;;  %1444 = vmatpush1.bf16.msra.mxu1 %v4019_v23  ;;  %v4108_v22 = vld [vmem:[#allocation2 + $0x464] ss:$16 sps:$4 sm:$0xff]   ;;  %v4111_v23 = vld [vmem:[#allocation2 + $0x46c] ss:$16 sps:$4 sm:$0xff]  }
  0x89   :  { %1322 = vmatprep.subr.bf16.mxu0 %v4024_v24  ;;  %1445 = vmatprep.subr.bf16.mxu1 %v4027_v25  ;;  %v4106_v24 = vld [vmem:[#allocation2 + $0x460] ss:$16 sps:$4 sm:$0xff]   ;;  %v4109_v25 = vld [vmem:[#allocation2 + $0x468] ss:$16 sps:$4 sm:$0xff]  }
  0x8c   :  { %1323 = vmatpush1.bf16.msra.mxu0 %v4022_v26  ;;  %1446 = vmatpush1.bf16.msra.mxu1 %v4025_v27  ;;  %v4114_v26 = vld [vmem:[#allocation2 + $0x484] ss:$16 sps:$4 sm:$0xff]   ;;  %v4117_v27 = vld [vmem:[#allocation2 + $0x48c] ss:$16 sps:$4 sm:$0xff]  }
  0x8d   :  { %1324 = vmatprep.subr.bf16.mxu0 %v4030_v28  ;;  %1447 = vmatprep.subr.bf16.mxu1 %v4033_v29  ;;  %v4112_v28 = vld [vmem:[#allocation2 + $0x480] ss:$16 sps:$4 sm:$0xff]   ;;  %v4115_v29 = vld [vmem:[#allocation2 + $0x488] ss:$16 sps:$4 sm:$0xff]  }
  0x90   :  { %1325 = vmatpush1.bf16.msra.mxu0 %v4028_v31  ;;  %1448 = vmatpush1.bf16.msra.mxu1 %v4031_v33  ;;  %v4123_v31 = vld [vmem:[#allocation2 + $0x4ac] ss:$16 sps:$4 sm:$0xff]   ;;  %v4121_v33 = vld [vmem:[#allocation2 + $0x4a8] ss:$16 sps:$4 sm:$0xff]  }
  0x91   :  { %1326 = vmatprep.subr.bf16.mxu0 %v4036_v34  ;;  %1449 = vmatprep.subr.bf16.mxu1 %v4039_v35  ;;  %v4126_v34 = vld [vmem:[#allocation2 + $0x4c4] ss:$16 sps:$4 sm:$0xff]   ;;  %v4129_v35 = vld [vmem:[#allocation2 + $0x4cc] ss:$16 sps:$4 sm:$0xff]  }
  0x94   :  { %1327 = vmatpush1.bf16.msra.mxu0 %v4034_v36  ;;  %1450 = vmatpush1.bf16.msra.mxu1 %v4037_v37  ;;  %v4124_v36 = vld [vmem:[#allocation2 + $0x4c0] ss:$16 sps:$4 sm:$0xff]   ;;  %v4127_v37 = vld [vmem:[#allocation2 + $0x4c8] ss:$16 sps:$4 sm:$0xff]  }
  0x95   :  { %1328 = vmatprep.subr.bf16.mxu0 %v4042_v38  ;;  %1451 = vmatprep.subr.bf16.mxu1 %v4045_v39  ;;  %v4132_v38 = vld [vmem:[#allocation2 + $0x4e4] ss:$16 sps:$4 sm:$0xff]   ;;  %v4135_v39 = vld [vmem:[#allocation2 + $0x4ec] ss:$16 sps:$4 sm:$0xff]  }
  0x98   :  { %1329 = vmatpush1.bf16.msra.mxu0 %v4040_v40  ;;  %1452 = vmatpush1.bf16.msra.mxu1 %v4043_v41  ;;  %v4130_v40 = vld [vmem:[#allocation2 + $0x4e0] ss:$16 sps:$4 sm:$0xff]   ;;  %v4133_v41 = vld [vmem:[#allocation2 + $0x4e8] ss:$16 sps:$4 sm:$0xff]  }
  0x99   :  { %1330 = vmatprep.subr.bf16.mxu0 %v4048_v42  ;;  %1453 = vmatprep.subr.bf16.mxu1 %v4051_v43  ;;  %v4138_v42 = vld [vmem:[#allocation2 + $0x504] ss:$16 sps:$4 sm:$0xff]   ;;  %v4141_v43 = vld [vmem:[#allocation2 + $0x50c] ss:$16 sps:$4 sm:$0xff]  }
  0x9c   :  { %1331 = vmatpush1.bf16.msra.mxu0 %v4046_v44  ;;  %1454 = vmatpush1.bf16.msra.mxu1 %v4049_v45  ;;  %v4136_v44 = vld [vmem:[#allocation2 + $0x500] ss:$16 sps:$4 sm:$0xff]   ;;  %v4139_v45 = vld [vmem:[#allocation2 + $0x508] ss:$16 sps:$4 sm:$0xff]  }
  0x9d   :  { %1332 = vmatprep.subr.bf16.mxu0 %v4054_v46  ;;  %1455 = vmatprep.subr.bf16.mxu1 %v4057_v47  ;;  %v4144_v46 = vld [vmem:[#allocation2 + $0x524] ss:$16 sps:$4 sm:$0xff]   ;;  %v4147_v47 = vld [vmem:[#allocation2 + $0x52c] ss:$16 sps:$4 sm:$0xff]  }
  0xa0   :  { %1333 = vmatpush1.bf16.msra.mxu0 %v4052_v48  ;;  %1456 = vmatpush1.bf16.msra.mxu1 %v4055_v49  ;;  %v4142_v48 = vld [vmem:[#allocation2 + $0x520] ss:$16 sps:$4 sm:$0xff]   ;;  %v4145_v49 = vld [vmem:[#allocation2 + $0x528] ss:$16 sps:$4 sm:$0xff]  }
  0xa1   :  { %1334 = vmatprep.subr.bf16.mxu0 %v4060_v50  ;;  %1457 = vmatprep.subr.bf16.mxu1 %v4063_v51  ;;  %v4150_v50 = vld [vmem:[#allocation2 + $0x544] ss:$16 sps:$4 sm:$0xff]   ;;  %v4153_v51 = vld [vmem:[#allocation2 + $0x54c] ss:$16 sps:$4 sm:$0xff]  }
  0xa4   :  { %1335 = vmatpush1.bf16.msra.mxu0 %v4058_v52  ;;  %1458 = vmatpush1.bf16.msra.mxu1 %v4061_v53  ;;  %v4148_v52 = vld [vmem:[#allocation2 + $0x540] ss:$16 sps:$4 sm:$0xff]   ;;  %v4151_v53 = vld [vmem:[#allocation2 + $0x548] ss:$16 sps:$4 sm:$0xff]  }
  0xa5   :  { %1336 = vmatprep.subr.bf16.mxu0 %v4066_v54  ;;  %1459 = vmatprep.subr.bf16.mxu1 %v4069_v55  ;;  %v4156_v54 = vld [vmem:[#allocation2 + $0x564] ss:$16 sps:$4 sm:$0xff]   ;;  %v4159_v55 = vld [vmem:[#allocation2 + $0x56c] ss:$16 sps:$4 sm:$0xff]  }
  0xa8   :  { %1337 = vmatpush1.bf16.msra.mxu0 %v4064_v56  ;;  %1460 = vmatpush1.bf16.msra.mxu1 %v4067_v57  ;;  %v4154_v56 = vld [vmem:[#allocation2 + $0x560] ss:$16 sps:$4 sm:$0xff]   ;;  %v4157_v57 = vld [vmem:[#allocation2 + $0x568] ss:$16 sps:$4 sm:$0xff]  }
  0xa9   :  { %1338 = vmatprep.subr.bf16.mxu0 %v4072_v58  ;;  %1461 = vmatprep.subr.bf16.mxu1 %v4075_v59  ;;  %v4162_v58 = vld [vmem:[#allocation2 + $0x584] ss:$16 sps:$4 sm:$0xff]   ;;  %v4165_v59 = vld [vmem:[#allocation2 + $0x58c] ss:$16 sps:$4 sm:$0xff]  }
  0xac   :  { %1339 = vmatpush1.bf16.msra.mxu0 %v4070_v60  ;;  %1462 = vmatpush1.bf16.msra.mxu1 %v4073_v61  ;;  %v4160_v60 = vld [vmem:[#allocation2 + $0x580] ss:$16 sps:$4 sm:$0xff]   ;;  %v4163_v61 = vld [vmem:[#allocation2 + $0x588] ss:$16 sps:$4 sm:$0xff]  }
  0xad   :  { %1340 = vmatprep.subr.bf16.mxu0 %v4078_v62  ;;  %1463 = vmatprep.subr.bf16.mxu1 %v4081_v63  ;;  %v4168_v62 = vld [vmem:[#allocation2 + $0x5a4] ss:$16 sps:$4 sm:$0xff]   ;;  %v4171_v63 = vld [vmem:[#allocation2 + $0x5ac] ss:$16 sps:$4 sm:$0xff]  }
  0xb0   :  { %1341 = vmatpush1.bf16.msra.mxu0 %v4076_v0  ;;  %1464 = vmatpush1.bf16.msra.mxu1 %v4079_v1  ;;  %v4166_v0 = vld [vmem:[#allocation2 + $0x5a0] ss:$16 sps:$4 sm:$0xff]   ;;  %v4169_v1 = vld [vmem:[#allocation2 + $0x5a8] ss:$16 sps:$4 sm:$0xff]  }
  0xb1   :  { %1342 = vmatprep.subr.bf16.mxu0 %v4084_v2  ;;  %1465 = vmatprep.subr.bf16.mxu1 %v4087_v3  ;;  %v4174_v2 = vld [vmem:[#allocation2 + $0x5c4] ss:$16 sps:$4 sm:$0xff]   ;;  %v4177_v3 = vld [vmem:[#allocation2 + $0x5cc] ss:$16 sps:$4 sm:$0xff]  }
  0xb4   :  { %1343 = vmatpush1.bf16.msra.mxu0 %v4082_v4  ;;  %1466 = vmatpush1.bf16.msra.mxu1 %v4085_v5  ;;  %v4172_v4 = vld [vmem:[#allocation2 + $0x5c0] ss:$16 sps:$4 sm:$0xff]   ;;  %v4175_v5 = vld [vmem:[#allocation2 + $0x5c8] ss:$16 sps:$4 sm:$0xff]  }
  0xb5   :  { %1353 = vmatprep.subr.bf16.mxu0 %v4090_v6  ;;  %1476 = vmatprep.subr.bf16.mxu1 %v4093_v8  ;;  %v4180_v6 = vld [vmem:[#allocation2 + $0x5e4] ss:$16 sps:$4 sm:$0xff]   ;;  %v4178_v8 = vld [vmem:[#allocation2 + $0x5e0] ss:$16 sps:$4 sm:$0xff]  }
  0xb7   :  { %1345 = vmatmul.mubr.bf16.vlgmr.msra.gmra.mrb[0].mxu0 %v93_v10  ;;  %1468 = vmatmul.mubr.bf16.vlgmr.msra.gmra.mrb[0].mxu1 %v93_v10  ;;  %v89_v10 = vld [vmem:[%s4896_s0 + $0x20] sm:$0xff] }
  0xb8   :  { %1354 = vmatpush1.bf16.msra.mxu0 %v4088_v9  ;;  %1477 = vmatpush1.bf16.msra.mxu1 %v4091_v11  ;;  %v4181_v9 = vld [vmem:[#allocation2 + $0x5e8] ss:$16 sps:$4 sm:$0xff]   ;;  %v95_v11 = vpack.c.bf16 %v89_v10, %v89_v10 }
  0xb9   :  { %1355 = vmatprep.subr.bf16.mxu0 %v4096_v12  ;;  %1478 = vmatprep.subr.bf16.mxu1 %v4099_v13  ;;  %v76_v12 = vlaneseq }
  0xba   :  { %1385 = vmatprep.mubr.bf16.mxu0 %v96_v17  ;;  %1508 = vmatprep.mubr.bf16.mxu1 %v96_v17 }
  0xbb   :  { %v4639_v13 = vshrl.u32 %v76_v12, 7 }
  0xbc   :  { %1356 = vmatpush1.bf16.msra.mxu0 %v4094_v15  ;;  %1479 = vmatpush1.bf16.msra.mxu1 %v4097_v16  ;;  %v289_v16 = vld [vmem:[%s4898_s2] sm:$0xf] }
  0xbd   :  { %1357 = vmatprep.subr.bf16.mxu0 %v4102_v18  ;;  %1480 = vmatprep.subr.bf16.mxu1 %v4105_v19  ;;  %v293_v14 = vsub.s32 0, %v4639_v13  ;;  %v301_v15 = vsub.s32 2, %v4639_v13  ;;  %v297_v17 = vsub.s32 1, %v4639_v13  ;;  %v305_v18 = vsub.s32 3, %v4639_v13  ;;  %v4408_v13 = vld [vmem:[#allocation6 + $0x40] sm:$0xff]  }
  0xbf   :  { %v294_v19 = vrot.slane %v289_v16, %v293_v14 }
  0xc0   :  { %1358 = vmatpush1.bf16.msra.mxu0 %v4100_v20  ;;  %1481 = vmatpush1.bf16.msra.mxu1 %v4103_v21  ;;  %v302_v20 = vrot.slane %v289_v16, %v301_v15  ;;  %v298_v21 = vrot.slane %v289_v16, %v297_v17 }
  0xc1   :  { %1359 = vmatprep.subr.bf16.mxu0 %v4108_v22  ;;  %1482 = vmatprep.subr.bf16.mxu1 %v4111_v23  ;;  %v306_v22 = vrot.slane %v289_v16, %v305_v18  ;;  %v77_v23 = vand.u32 127, %v76_v12 }
  0xc4   :  { %1360 = vmatpush1.bf16.msra.mxu0 %v4106_v24  ;;  %1483 = vmatpush1.bf16.msra.mxu1 %v4109_v25 }
  0xc5   :  { %1361 = vmatprep.subr.bf16.mxu0 %v4114_v26  ;;  %1484 = vmatprep.subr.bf16.mxu1 %v4117_v27 }
  0xc8   :  { %1362 = vmatpush1.bf16.msra.mxu0 %v4112_v28  ;;  %1485 = vmatpush1.bf16.msra.mxu1 %v4115_v29 }
  0xc9   :  { %1363 = vmatprep.subr.bf16.mxu0 %v4120_v30  ;;  %1486 = vmatprep.subr.bf16.mxu1 %v4123_v31 }
  0xcc   :  { %1364 = vmatpush1.bf16.msra.mxu0 %v4118_v32  ;;  %1487 = vmatpush1.bf16.msra.mxu1 %v4121_v33 }
  0xcd   :  { %1365 = vmatprep.subr.bf16.mxu0 %v4126_v34  ;;  %1488 = vmatprep.subr.bf16.mxu1 %v4129_v35  ;;  %v4664_v34 = vadd.s32 384, %v77_v23 }
  0xcf   :  { %vm84_vm3 = vcmp.lt.s32.totalorder %v4664_v34, 400  ;;  %v4428_v34 = vld [vmem:[#allocation6 + $0x68] sm:$0xff]  }
  0xd0   :  { %1366 = vmatpush1.bf16.msra.mxu0 %v4124_v36  ;;  %1489 = vmatpush1.bf16.msra.mxu1 %v4127_v37 }
  0xd1   :  { %1367 = vmatprep.subr.bf16.mxu0 %v4132_v38  ;;  %1490 = vmatprep.subr.bf16.mxu1 %v4135_v39 }
  0xd4   :  { %1368 = vmatpush1.bf16.msra.mxu0 %v4130_v40  ;;  %1491 = vmatpush1.bf16.msra.mxu1 %v4133_v41 }
  0xd5   :  { %1369 = vmatprep.subr.bf16.mxu0 %v4138_v42  ;;  %1492 = vmatprep.subr.bf16.mxu1 %v4141_v43 }
  0xd8   :  { %1370 = vmatpush1.bf16.msra.mxu0 %v4136_v44  ;;  %1493 = vmatpush1.bf16.msra.mxu1 %v4139_v45 }
  0xd9   :  { %1371 = vmatprep.subr.bf16.mxu0 %v4144_v46  ;;  %1494 = vmatprep.subr.bf16.mxu1 %v4147_v47 }
  0xdc   :  { %1372 = vmatpush1.bf16.msra.mxu0 %v4142_v48  ;;  %1495 = vmatpush1.bf16.msra.mxu1 %v4145_v49 }
  0xdd   :  { %1373 = vmatprep.subr.bf16.mxu0 %v4150_v50  ;;  %1496 = vmatprep.subr.bf16.mxu1 %v4153_v51 }
  0xe0   :  { %1374 = vmatpush1.bf16.msra.mxu0 %v4148_v52  ;;  %1497 = vmatpush1.bf16.msra.mxu1 %v4151_v53 }
  0xe1   :  { %1375 = vmatprep.subr.bf16.mxu0 %v4156_v54  ;;  %1498 = vmatprep.subr.bf16.mxu1 %v4159_v55 }
  0xe4   :  { %1376 = vmatpush1.bf16.msra.mxu0 %v4154_v56  ;;  %1499 = vmatpush1.bf16.msra.mxu1 %v4157_v57 }
  0xe5   :  { %1377 = vmatprep.subr.bf16.mxu0 %v4162_v58  ;;  %1500 = vmatprep.subr.bf16.mxu1 %v4165_v59 }
  0xe8   :  { %1378 = vmatpush1.bf16.msra.mxu0 %v4160_v60  ;;  %1501 = vmatpush1.bf16.msra.mxu1 %v4163_v61 }
  0xe9   :  { %1379 = vmatprep.subr.bf16.mxu0 %v4168_v62  ;;  %1502 = vmatprep.subr.bf16.mxu1 %v4171_v63 }
  0xec   :  { %1380 = vmatpush1.bf16.msra.mxu0 %v4166_v0  ;;  %1503 = vmatpush1.bf16.msra.mxu1 %v4169_v1 }
  0xed   :  { %1381 = vmatprep.subr.bf16.mxu0 %v4174_v2  ;;  %1504 = vmatprep.subr.bf16.mxu1 %v4177_v3 }
  0xf0   :  { %1382 = vmatpush1.bf16.msra.mxu0 %v4172_v4  ;;  %1505 = vmatpush1.bf16.msra.mxu1 %v4175_v5 }
  0xf1   :  { %1383 = vmatprep.subr.bf16.mxu0 %v4180_v6  ;;  %1506 = vmatprep.subr.bf16.mxu1 %v4183_v7 }
  0xf4   :  { %1384 = vmatpush1.bf16.msra.mxu0 %v4178_v8  ;;  %1507 = vmatpush1.bf16.msra.mxu1 %v4181_v9 }
  0xf7   :  { %1386 = vmatmul.mubr.bf16.vlgmr.msra.gmra.mrb[0].mxu0 %v95_v11  ;;  %1509 = vmatmul.mubr.bf16.vlgmr.msra.gmra.mrb[0].mxu1 %v95_v11 }
 0x1ca   :  { %v1387_v24 = vpop.f32.mrb[0].mxu0  ;;  %v1510_v25 = vpop.f32.mrb[0].mxu1 }
 0x1cb   :  { %v4656_v26 = vadd.f32 %v1387_v24, %v294_v19  ;;  %v4658_v27 = vadd.f32 %v1510_v25, %v302_v20  ;;  %v1389_v28 = vpop.f32.mrb[1].mxu0  ;;  %v1512_v29 = vpop.f32.mrb[1].mxu1 }
 0x1cc   :  { %v4660_v30 = vadd.f32 %v1389_v28, %v298_v21  ;;  %v4662_v31 = vadd.f32 %v1512_v29, %v306_v22  ;;  %v1391_v32 = vpop.f32.mrb[2].mxu0  ;;  %v1514_v33 = vpop.f32.mrb[2].mxu1 }
 0x1cd   :  { %v1908_v35 = vsel %vm1907_vm0, %v4656_v26, -inf  ;;  %v1937_v36 = vsel %vm1936_vm1, %v4656_v26, -inf  ;;  %v1922_v37 = vsel %vm1907_vm0, %v4658_v27, -inf  ;;  %v1951_v38 = vsel %vm1936_vm1, %v4658_v27, -inf  ;;  %v1392_v39 = vpop.f32.mrb[3].mxu0  ;;  %v1515_v40 = vpop.f32.mrb[3].mxu1 }
 0x1ce   :  { %v1909_v41 = vrot.slane %v1908_v35, 4  ;;  %v1938_v42 = vrot.slane %v1937_v36, 4  ;;  %v1923_v43 = vrot.slane %v1922_v37, 4  ;;  %v1952_v44 = vrot.slane %v1951_v38, 4 }
 0x1cf   :  { %v1915_v45 = vsel %vm1907_vm0, %v4660_v30, -inf  ;;  %v1944_v46 = vsel %vm1936_vm1, %v4660_v30, -inf  ;;  %v1929_v47 = vsel %vm1907_vm0, %v4662_v31, -inf  ;;  %v1958_v48 = vsel %vm1936_vm1, %v4662_v31, -inf }
 0x1d0   :  { %v1910_v49 = vmax.f32 %v1908_v35, %v1909_v41  ;;  %v1939_v50 = vmax.f32 %v1937_v36, %v1938_v42  ;;  %v1924_v51 = vmax.f32 %v1922_v37, %v1923_v43  ;;  %v1953_v52 = vmax.f32 %v1951_v38, %v1952_v44 }
 0x1d1   :  { %v1916_v53 = vrot.slane %v1915_v45, 4  ;;  %v1945_v54 = vrot.slane %v1944_v46, 4  ;;  %v1930_v55 = vrot.slane %v1929_v47, 4  ;;  %v1959_v56 = vrot.slane %v1958_v48, 4 }
 0x1d2   :  { %v1911_v57 = vrot.slane %v1910_v49, 2  ;;  %v1940_v58 = vrot.slane %v1939_v50, 2  ;;  %v1925_v59 = vrot.slane %v1924_v51, 2  ;;  %v1954_v60 = vrot.slane %v1953_v52, 2 }
 0x1d3   :  { %v1917_v61 = vmax.f32 %v1915_v45, %v1916_v53  ;;  %v1946_v62 = vmax.f32 %v1944_v46, %v1945_v54  ;;  %v1931_v63 = vmax.f32 %v1929_v47, %v1930_v55  ;;  %v1960_v0 = vmax.f32 %v1958_v48, %v1959_v56 }
 0x1d4   :  { %v1912_v1 = vmax.f32 %v1910_v49, %v1911_v57  ;;  %v1941_v2 = vmax.f32 %v1939_v50, %v1940_v58  ;;  %v1926_v3 = vmax.f32 %v1924_v51, %v1925_v59  ;;  %v1955_v4 = vmax.f32 %v1953_v52, %v1954_v60 }
 0x1d5   :  { %v1918_v5 = vrot.slane %v1917_v61, 2  ;;  %v1947_v6 = vrot.slane %v1946_v62, 2  ;;  %v1932_v7 = vrot.slane %v1931_v63, 2  ;;  %v1961_v8 = vrot.slane %v1960_v0, 2 }
 0x1d6   :  { %v1913_v9 = vrot.slane %v1912_v1, 1  ;;  %v1942_v10 = vrot.slane %v1941_v2, 1  ;;  %v1927_v11 = vrot.slane %v1926_v3, 1  ;;  %v1956_v12 = vrot.slane %v1955_v4, 1 }
 0x1d7   :  { %v1919_v16 = vmax.f32 %v1917_v61, %v1918_v5  ;;  %v1948_v19 = vmax.f32 %v1946_v62, %v1947_v6  ;;  %v1933_v20 = vmax.f32 %v1931_v63, %v1932_v7  ;;  %v1962_v21 = vmax.f32 %v1960_v0, %v1961_v8 }
 0x1d8   :  { %v1914_v22 = vmax.f32 %v1912_v1, %v1913_v9  ;;  %v1943_v23 = vmax.f32 %v1941_v2, %v1942_v10  ;;  %v1928_v24 = vmax.f32 %v1926_v3, %v1927_v11  ;;  %v1957_v25 = vmax.f32 %v1955_v4, %v1956_v12  ;;  %v4184_v11 = vld [vmem:[%s4899_s3 + $0x40] sm:$0xff]  }
 0x1d9   :  { %v1920_v28 = vrot.slane %v1919_v16, 1  ;;  %v1949_v29 = vrot.slane %v1948_v19, 1  ;;  %v1934_v32 = vrot.slane %v1933_v20, 1  ;;  %v1963_v33 = vrot.slane %v1962_v21, 1  ;;  %v4185_v12 = vld [vmem:[%s4899_s3 + $0xc0] sm:$0xff]   ;;  %3769 = vmatprep.subr.bf16.mxu0 %v4184_v11  ;;  %v4214_v11 = vld [vmem:[%s4899_s3 + $0x38] sm:$0xff]  }
 0x1da   :  { %v1529_v35 = vadd.f32 %v4660_v30, %v4656_v26  ;;  %v1966_v36 = vsel %vm1965_vm2, %v1914_v22, %v1943_v23  ;;  %v1968_v37 = vsel %vm1965_vm2, %v1928_v24, %v1957_v25  ;;  %v1528_v42 = vsel %vm84_vm3, %v4662_v31, 0.0  ;;  %3791 = vmatprep.subr.bf16.mxu1 %v4185_v12  ;;  %v4190_v22 = vld [vmem:[%s4899_s3 + $0x8] sm:$0xff]   ;;  %v4192_v24 = vld [vmem:[%s4899_s3 + $0x50] sm:$0xff]   ;;  %v4215_v12 = vld [vmem:[%s4899_s3 + $0xb8] sm:$0xff]  }
 0x1db   :  { %v1921_v38 = vmax.f32 %v1919_v16, %v1920_v28  ;;  %v1950_v39 = vmax.f32 %v1948_v19, %v1949_v29  ;;  %v1935_v40 = vmax.f32 %v1933_v20, %v1934_v32  ;;  %v1964_v41 = vmax.f32 %v1962_v21, %v1963_v33  ;;  %v4186_v16 = vld [vmem:[%s4899_s3] sm:$0xff]   ;;  %v4188_v20 = vld [vmem:[%s4899_s3 + $0x48] sm:$0xff]   ;;  %v4193_v25 = vld [vmem:[%s4899_s3 + $0xd0] sm:$0xff]  }
 0x1dc   :  { %v1530_v43 = vadd.f32 %v4658_v27, %v1529_v35  ;;  %v1970_v44 = vsel %vm1907_vm0, %v1966_v36, 0.0  ;;  %v1972_v45 = vsel %vm1907_vm0, %v1968_v37, 0.0  ;;  %v4187_v19 = vld [vmem:[%s4899_s3 + $0x80] sm:$0xff]   ;;  %v4189_v21 = vld [vmem:[%s4899_s3 + $0xc8] sm:$0xff]   ;;  %3770 = vmatpush3.bf16.msra.mxu0 %v4186_v16  ;;  %v4194_v28 = vld [vmem:[%s4899_s3 + $0x10] sm:$0xff]  }
 0x1dd   :  { %v1967_v46 = vsel %vm1965_vm2, %v1921_v38, %v1950_v39  ;;  %v1969_v47 = vsel %vm1965_vm2, %v1935_v40, %v1964_v41  ;;  %v1975_v48 = vsel %vm1974_vm4, %v1970_v44, 0.0  ;;  %v1977_v49 = vsel %vm1974_vm4, %v1972_v45, 0.0  ;;  %3792 = vmatpush3.bf16.msra.mxu1 %v4187_v19  ;;  %v4191_v23 = vld [vmem:[%s4899_s3 + $0x88] sm:$0xff]   ;;  %3771 = vmatprep.subr.bf16.mxu0 %v4188_v20  ;;  %v4195_v29 = vld [vmem:[%s4899_s3 + $0x90] sm:$0xff]   ;;  %v4196_v32 = vld [vmem:[%s4899_s3 + $0x58] sm:$0xff]  }
 0x1de   :  { %v1531_v50 = vadd.f32 %v1530_v43, %v1528_v42  ;;  %v1971_v51 = vsel %vm1907_vm0, %v1967_v46, 0.0  ;;  %v1973_v52 = vsel %vm1907_vm0, %v1969_v47, 0.0  ;;  %v1980_v53 = vsel %vm1979_vm5, %v1975_v48, 0.0  ;;  %3793 = vmatprep.subr.bf16.mxu1 %v4189_v21  ;;  %v4197_v33 = vld [vmem:[%s4899_s3 + $0xd8] sm:$0xff]   ;;  %v4218_v16 = vld [vmem:[#allocation4 + $0x4] ss:$16 sps:$4 sm:$0xff]  }
 0x1df   :  { %v1976_v54 = vsel %vm1974_vm4, %v1971_v51, 0.0  ;;  %v1978_v55 = vsel %vm1974_vm4, %v1973_v52, 0.0  ;;  %v1982_v56 = vsel %vm1979_vm5, %v1977_v49, 0.0  ;;  %v1985_v57 = vsel %vm1984_vm6, %v1980_v53, 0.0  ;;  %v4221_v19 = vld [vmem:[#allocation4 + $0xc] ss:$16 sps:$4 sm:$0xff]  }
 0x1e0   :  { %1532 = vadd.xlane.f32.xlu0 %v1531_v50  ;;  %v1981_v58 = vsel %vm1979_vm5, %v1976_v54, 0.0  ;;  %v1983_v59 = vsel %vm1979_vm5, %v1978_v55, 0.0  ;;  %v1987_v60 = vsel %vm1984_vm6, %v1982_v56, 0.0  ;;  %v1990_v61 = vsel %vm1989_vm7, %v1985_v57, 0.0  ;;  %3772 = vmatpush3.bf16.msra.mxu0 %v4190_v22 }
 0x1e1   :  { %v1986_v62 = vsel %vm1984_vm6, %v1981_v58, 0.0  ;;  %v1988_v63 = vsel %vm1984_vm6, %v1983_v59, 0.0  ;;  %v1995_v0 = vsel %vm1994_vm8, %v1990_v61, 0.0  ;;  %v1992_v2 = vsel %vm1989_vm7, %v1987_v60, 0.0  ;;  %3794 = vmatpush3.bf16.msra.mxu1 %v4191_v23  ;;  %3773 = vmatprep.subr.bf16.mxu0 %v4192_v24  ;;  %v4198_v59 = vld [vmem:[%s4899_s3 + $0x18] sm:$0xff]   ;;  %v4200_v61 = vld [vmem:[%s4899_s3 + $0x60] sm:$0xff]  }
 0x1e2   :  { %v1991_v1 = vsel %vm1989_vm7, %v1986_v62, 0.0  ;;  %v1993_v3 = vsel %vm1989_vm7, %v1988_v63, 0.0  ;;  %v1997_v7 = vsel %vm1994_vm8, %v1992_v2, 0.0  ;;  %3795 = vmatprep.subr.bf16.mxu1 %v4193_v25  ;;  %v4199_v60 = vld [vmem:[%s4899_s3 + $0x98] sm:$0xff]   ;;  %v4201_v62 = vld [vmem:[%s4899_s3 + $0xe0] sm:$0xff]   ;;  %v4205_v2 = vld [vmem:[%s4899_s3 + $0xe8] sm:$0xff]  }
 0x1e3   :  { %v1996_v4 = vsel %vm1994_vm8, %v1991_v1, 0.0  ;;  %v1998_v5 = vsel %vm1994_vm8, %v1993_v3, 0.0  ;;  %v4202_v63 = vld [vmem:[%s4899_s3 + $0x20] sm:$0xff]   ;;  %v4204_v1 = vld [vmem:[%s4899_s3 + $0x68] sm:$0xff]  }
 0x1e4   :  { %v2003_v6 = vadd.f32 %v1996_v4, %v1995_v0  ;;  %v2002_v9 = vsel %vm84_vm3, %v1998_v5, 0.0  ;;  %3774 = vmatpush3.bf16.msra.mxu0 %v4194_v28  ;;  %v4206_v3 = vld [vmem:[%s4899_s3 + $0x28] sm:$0xff]  }
 0x1e5   :  { %3796 = vmatpush3.bf16.msra.mxu1 %v4195_v29  ;;  %3775 = vmatprep.subr.bf16.mxu0 %v4196_v32 }
 0x1e6   :  { %v2004_v8 = vadd.f32 %v2003_v6, %v1997_v7  ;;  %3797 = vmatprep.subr.bf16.mxu1 %v4197_v33  ;;  %v4209_v6 = vld [vmem:[%s4899_s3 + $0xf0] sm:$0xff]  }
 0x1e8   :  { %v2005_v10 = vadd.f32 %v2004_v8, %v2002_v9  ;;  %3776 = vmatpush3.bf16.msra.mxu0 %v4198_v59  ;;  %v4211_v8 = vld [vmem:[%s4899_s3 + $0xb0] sm:$0xff]   ;;  %v4212_v9 = vld [vmem:[%s4899_s3 + $0x78] sm:$0xff]  }
 0x1e9   :  { %3798 = vmatpush3.bf16.msra.mxu1 %v4199_v60  ;;  %3777 = vmatprep.subr.bf16.mxu0 %v4200_v61  ;;  %v4240_v59 = vld [vmem:[#allocation4 + $0x80] ss:$16 sps:$4 sm:$0xff]   ;;  %v4243_v60 = vld [vmem:[#allocation4 + $0x88] ss:$16 sps:$4 sm:$0xff]   ;;  %v4251_v61 = vld [vmem:[#allocation4 + $0xac] ss:$16 sps:$4 sm:$0xff]  }
 0x1ea   :  { %2006 = vadd.xlane.f32.xlu0 %v2005_v10  ;;  %3799 = vmatprep.subr.bf16.mxu1 %v4201_v62  ;;  %v4213_v10 = vld [vmem:[%s4899_s3 + $0xf8] sm:$0xff]   ;;  %v4246_v62 = vld [vmem:[#allocation4 + $0xa0] ss:$16 sps:$4 sm:$0xff]  }
 0x1ec   :  { %3778 = vmatpush3.bf16.msra.mxu0 %v4202_v63  ;;  %v4249_v63 = vld [vmem:[#allocation4 + $0xa8] ss:$16 sps:$4 sm:$0xff]  }
 0x1ed   :  { %3779 = vmatprep.subr.bf16.mxu0 %v4204_v1  ;;  %v4257_v1 = vld [vmem:[#allocation4 + $0xcc] ss:$16 sps:$4 sm:$0xff]  }
 0x1f0   :  { %3780 = vmatpush3.bf16.msra.mxu0 %v4206_v3  ;;  %v4255_v3 = vld [vmem:[#allocation4 + $0xc8] ss:$16 sps:$4 sm:$0xff]  }
 0x26d   :  { %v1533_v35 = vpop.xlane.xlu0 %1532 }
 0x26e   :  { %v1534_v36 = vmul.f32 0.0025, %v1533_v35 }
 0x270   :  { %v4762_v37 = vsub.f32 %v4656_v26, %v1534_v36  ;;  %v4765_v38 = vsub.f32 %v4660_v30, %v1534_v36  ;;  %v4768_v39 = vsub.f32 %v4658_v27, %v1534_v36  ;;  %v1538_v40 = vsub.f32 %v4662_v31, %v1534_v36 }
 0x272   :  { %v1543_v41 = vmul.f32 %v4762_v37, %v4762_v37  ;;  %v1544_v42 = vmul.f32 %v4765_v38, %v4765_v38  ;;  %v4777_v43 = vsel %vm84_vm3, %v1538_v40, 0.0  ;;  %v1545_v26 = vmul.f32 %v4768_v39, %v4768_v39 }
 0x273   :  { %v1546_v27 = vmul.f32 %v4777_v43, %v4777_v43 }
 0x274   :  { %v1547_v30 = vadd.f32 %v1544_v42, %v1543_v41  ;;  %v4216_v41 = vld [vmem:[#allocation4] ss:$16 sps:$4 sm:$0xff]   ;;  %v4219_v42 = vld [vmem:[#allocation4 + $0x8] ss:$16 sps:$4 sm:$0xff]  }
 0x276   :  { %v1548_v44 = vadd.f32 %v1547_v30, %v1545_v26 }
 0x277   :  { %v2007_v45 = vpop.xlane.xlu0 %2006 }
 0x278   :  { %v1549_v31 = vadd.f32 %v1548_v44, %v1546_v27  ;;  %v2008_v46 = vmul.f32 0.0025, %v2007_v45  ;;  %v4224_v27 = vld [vmem:[#allocation4 + $0x24] ss:$16 sps:$4 sm:$0xff]   ;;  %v4227_v44 = vld [vmem:[#allocation4 + $0x2c] ss:$16 sps:$4 sm:$0xff]  }
 0x27a   :  { %1550 = vadd.xlane.f32.xlu1 %v1549_v31  ;;  %v4783_v47 = vsub.f32 %v1995_v0, %v2008_v46  ;;  %v4785_v48 = vsub.f32 %v1996_v4, %v2008_v46  ;;  %v4787_v49 = vsub.f32 %v1997_v7, %v2008_v46  ;;  %v2012_v50 = vsub.f32 %v1998_v5, %v2008_v46  ;;  %v4203_v0 = vld [vmem:[%s4899_s3 + $0xa0] sm:$0xff]   ;;  %v4207_v4 = vld [vmem:[%s4899_s3 + $0xa8] sm:$0xff]   ;;  %v4208_v5 = vld [vmem:[%s4899_s3 + $0x70] sm:$0xff]  }
 0x27b   :  { %3800 = vmatpush3.bf16.msra.mxu1 %v4203_v0  ;;  %v4210_v7 = vld [vmem:[%s4899_s3 + $0x30] sm:$0xff]   ;;  %3781 = vmatprep.subr.bf16.mxu0 %v4208_v5  ;;  %v4231_v46 = vld [vmem:[#allocation4 + $0x48] ss:$16 sps:$4 sm:$0xff]   ;;  %v4263_v5 = vld [vmem:[#allocation4 + $0xec] ss:$16 sps:$4 sm:$0xff]  }
 0x27c   :  { %v2017_v51 = vmul.f32 %v4783_v47, %v4783_v47  ;;  %v2018_v52 = vmul.f32 %v4785_v48, %v4785_v48  ;;  %v4795_v53 = vsel %vm84_vm3, %v2012_v50, 0.0  ;;  %v2019_v54 = vmul.f32 %v4787_v49, %v4787_v49  ;;  %3801 = vmatprep.subr.bf16.mxu1 %v4205_v2  ;;  %3782 = vmatpush3.bf16.msra.mxu0 %v4210_v7  ;;  %v4228_v31 = vld [vmem:[#allocation4 + $0x40] ss:$16 sps:$4 sm:$0xff]   ;;  %v4254_v0 = vld [vmem:[#allocation4 + $0xc4] ss:$16 sps:$4 sm:$0xff]  }
 0x27d   :  { %v2020_v56 = vmul.f32 %v4795_v53, %v4795_v53  ;;  %3783 = vmatprep.subr.bf16.mxu0 %v4212_v9  ;;  %v4252_v2 = vld [vmem:[#allocation4 + $0xc0] ss:$16 sps:$4 sm:$0xff]   ;;  %v4261_v7 = vld [vmem:[#allocation4 + $0xe8] ss:$16 sps:$4 sm:$0xff]   ;;  %v4269_v9 = vld [vmem:[#allocation4 + $0x10c] ss:$16 sps:$4 sm:$0xff]  }
 0x27e   :  { %v2021_v55 = vadd.f32 %v2018_v52, %v2017_v51  ;;  %v4236_v51 = vld [vmem:[#allocation4 + $0x64] ss:$16 sps:$4 sm:$0xff]   ;;  %v4239_v52 = vld [vmem:[#allocation4 + $0x6c] ss:$16 sps:$4 sm:$0xff]  }
 0x27f   :  { %3802 = vmatpush3.bf16.msra.mxu1 %v4207_v4  ;;  %v4260_v4 = vld [vmem:[#allocation4 + $0xe4] ss:$16 sps:$4 sm:$0xff]  }
 0x280   :  { %v2022_v57 = vadd.f32 %v2021_v55, %v2019_v54  ;;  %3803 = vmatprep.subr.bf16.mxu1 %v4209_v6  ;;  %3784 = vmatpush3.bf16.msra.mxu0 %v4214_v11  ;;  %v4234_v55 = vld [vmem:[#allocation4 + $0x60] ss:$16 sps:$4 sm:$0xff]   ;;  %v4267_v11 = vld [vmem:[#allocation4 + $0x108] ss:$16 sps:$4 sm:$0xff]  }
 0x281   :  { %2827 = vmatprep.subr.bf16.mxu0 %v4218_v16  ;;  %v4258_v6 = vld [vmem:[#allocation4 + $0xe0] ss:$16 sps:$4 sm:$0xff]   ;;  %v4275_v16 = vld [vmem:[#allocation4 + $0x12c] ss:$16 sps:$4 sm:$0xff]  }
 0x282   :  { %v2023_v58 = vadd.f32 %v2022_v57, %v2020_v56  ;;  %v4237_v56 = vld [vmem:[#allocation4 + $0x68] ss:$16 sps:$4 sm:$0xff]   ;;  %v4242_v57 = vld [vmem:[#allocation4 + $0x84] ss:$16 sps:$4 sm:$0xff]  }
 0x283   :  { %3804 = vmatpush3.bf16.msra.mxu1 %v4211_v8  ;;  %v4266_v8 = vld [vmem:[#allocation4 + $0x104] ss:$16 sps:$4 sm:$0xff]  }
 0x284   :  { %2024 = vadd.xlane.f32.xlu1 %v2023_v58  ;;  %3805 = vmatprep.subr.bf16.mxu1 %v4213_v10  ;;  %v4245_v58 = vld [vmem:[#allocation4 + $0x8c] ss:$16 sps:$4 sm:$0xff]   ;;  %v4264_v10 = vld [vmem:[#allocation4 + $0x100] ss:$16 sps:$4 sm:$0xff]  }
 0x287   :  { %3806 = vmatpush3.bf16.msra.mxu1 %v4215_v12  ;;  %v4272_v12 = vld [vmem:[#allocation4 + $0x124] ss:$16 sps:$4 sm:$0xff]  }
 0x288   :  { %2909 = vmatprep.subr.bf16.mxu1 %v4221_v19  ;;  %v4270_v19 = vld [vmem:[#allocation4 + $0x120] ss:$16 sps:$4 sm:$0xff]  }
 0x307   :  { %v1551_v20 = vpop.xlane.xlu1 %1550 }
 0x308   :  { %v1552_v21 = vmul.f32 0.0025, %v1551_v20  ;;  %v4273_v20 = vld [vmem:[#allocation4 + $0x128] ss:$16 sps:$4 sm:$0xff]  }
 0x30a   :  { %v1553_v22 = vadd.f32 1e-05, %v1552_v21  ;;  %v4278_v21 = vld [vmem:[#allocation4 + $0x144] ss:$16 sps:$4 sm:$0xff]  }
 0x30c   :  { %4440 = vrsqrt.f32 %v1553_v22  ;;  %v4281_v22 = vld [vmem:[#allocation4 + $0x14c] ss:$16 sps:$4 sm:$0xff]  }
 0x311   :  { %v2025_v23 = vpop.xlane.xlu1 %2024 }
 0x312   :  { %v2026_v24 = vmul.f32 0.0025, %v2025_v23  ;;  %v4276_v23 = vld [vmem:[#allocation4 + $0x140] ss:$16 sps:$4 sm:$0xff]  }
 0x314   :  { %v2027_v25 = vadd.f32 1e-05, %v2026_v24  ;;  %v4279_v24 = vld [vmem:[#allocation4 + $0x148] ss:$16 sps:$4 sm:$0xff]  }
 0x316   :  { %v4441_v28 = vpop.eup %4440  ;;  %4442 = vrsqrt.f32 %v2027_v25  ;;  %v4284_v25 = vld [vmem:[#allocation4 + $0x164] ss:$16 sps:$4 sm:$0xff]  }
 0x317   :  { %v1556_v29 = vmul.f32 %v4441_v28, %v4765_v38  ;;  %v1558_v32 = vmul.f32 %v4441_v28, %v4777_v43  ;;  %v1555_v33 = vmul.f32 %v4441_v28, %v4762_v37  ;;  %v1557_v35 = vmul.f32 %v4441_v28, %v4768_v39  ;;  %v4222_v38 = vld [vmem:[#allocation4 + $0x20] ss:$16 sps:$4 sm:$0xff]   ;;  %v4225_v43 = vld [vmem:[#allocation4 + $0x28] ss:$16 sps:$4 sm:$0xff]   ;;  %v4230_v37 = vld [vmem:[#allocation4 + $0x44] ss:$16 sps:$4 sm:$0xff]  }
 0x318   :  { %v4233_v39 = vld [vmem:[#allocation4 + $0x4c] ss:$16 sps:$4 sm:$0xff]  }
 0x319   :  { %v1560_v36 = vpack.c.bf16 %v1556_v29, %v1556_v29  ;;  %v1562_v40 = vpack.c.bf16 %v1558_v32, %v1558_v32  ;;  %v1559_v26 = vpack.c.bf16 %v1555_v33, %v1555_v33  ;;  %v1561_v30 = vpack.c.bf16 %v1557_v35, %v1557_v35  ;;  %v4287_v28 = vld [vmem:[#allocation4 + $0x16c] ss:$16 sps:$4 sm:$0xff]   ;;  %v4282_v29 = vld [vmem:[#allocation4 + $0x160] ss:$16 sps:$4 sm:$0xff]   ;;  %v4285_v32 = vld [vmem:[#allocation4 + $0x168] ss:$16 sps:$4 sm:$0xff]  }
 0x31a   :  { %v4290_v33 = vld [vmem:[#allocation4 + $0x184] ss:$16 sps:$4 sm:$0xff]   ;;  %v4293_v35 = vld [vmem:[#allocation4 + $0x18c] ss:$16 sps:$4 sm:$0xff]  }
 0x31b   :  { %1858 = vmatprep.mubr.bf16.mxu0 %v1560_v36  ;;  %1898 = vmatprep.mubr.bf16.mxu1 %v1562_v40  ;;  %v4288_v36 = vld [vmem:[#allocation4 + $0x180] ss:$16 sps:$4 sm:$0xff]   ;;  %v4291_v40 = vld [vmem:[#allocation4 + $0x188] ss:$16 sps:$4 sm:$0xff]  }
 0x31c   :  { %1859 = vmatmul.mubr.bf16.vlgmr.msra.gmra.mrb[4].mxu0 %v1559_v26  ;;  %1899 = vmatmul.mubr.bf16.vlgmr.msra.gmra.mrb[4].mxu1 %v1561_v30  ;;  %v4294_v26 = vld [vmem:[#allocation4 + $0x1a0] ss:$16 sps:$4 sm:$0xff]   ;;  %v4297_v30 = vld [vmem:[#allocation4 + $0x1a8] ss:$16 sps:$4 sm:$0xff]  }
 0x31d   :  { %2828 = vmatpush1.bf16.msra.mxu0 %v4216_v41  ;;  %2910 = vmatpush1.bf16.msra.mxu1 %v4219_v42  ;;  %v4296_v41 = vld [vmem:[#allocation4 + $0x1a4] ss:$16 sps:$4 sm:$0xff]   ;;  %v4299_v42 = vld [vmem:[#allocation4 + $0x1ac] ss:$16 sps:$4 sm:$0xff]  }
 0x31e   :  { %2829 = vmatprep.subr.bf16.mxu0 %v4224_v27  ;;  %2911 = vmatprep.subr.bf16.mxu1 %v4227_v44  ;;  %v4302_v27 = vld [vmem:[#allocation4 + $0x1c4] ss:$16 sps:$4 sm:$0xff]   ;;  %v4305_v44 = vld [vmem:[#allocation4 + $0x1cc] ss:$16 sps:$4 sm:$0xff]  }
 0x320   :  { %v4859_v45 = vpop.eup %4442 }
 0x321   :  { %2830 = vmatpush1.bf16.msra.mxu0 %v4222_v38  ;;  %2912 = vmatpush1.bf16.msra.mxu1 %v4225_v43  ;;  %v2030_v50 = vmul.f32 %v4859_v45, %v4785_v48  ;;  %v4248_v48 = vld [vmem:[#allocation4 + $0xa4] ss:$16 sps:$4 sm:$0xff]   ;;  %v4300_v38 = vld [vmem:[#allocation4 + $0x1c0] ss:$16 sps:$4 sm:$0xff]   ;;  %v4303_v43 = vld [vmem:[#allocation4 + $0x1c8] ss:$16 sps:$4 sm:$0xff]  }
 0x322   :  { %2831 = vmatprep.subr.bf16.mxu0 %v4230_v37  ;;  %2913 = vmatprep.subr.bf16.mxu1 %v4233_v39  ;;  %v4308_v37 = vld [vmem:[#allocation4 + $0x1e4] ss:$16 sps:$4 sm:$0xff]   ;;  %v4311_v39 = vld [vmem:[#allocation4 + $0x1ec] ss:$16 sps:$4 sm:$0xff]  }
 0x323   :  { %v2034_v54 = vpack.c.bf16 %v2030_v50, %v2030_v50  ;;  %v2029_v50 = vmul.f32 %v4859_v45, %v4783_v47  ;;  %v4318_v47 = vld [vmem:[#allocation4 + $0x220] ss:$16 sps:$4 sm:$0xff]  }
 0x325   :  { %2832 = vmatpush1.bf16.msra.mxu0 %v4228_v31  ;;  %2914 = vmatpush1.bf16.msra.mxu1 %v4231_v46  ;;  %v4306_v31 = vld [vmem:[#allocation4 + $0x1e0] ss:$16 sps:$4 sm:$0xff]   ;;  %v4309_v46 = vld [vmem:[#allocation4 + $0x1e8] ss:$16 sps:$4 sm:$0xff]  }
 0x326   :  { %2833 = vmatprep.subr.bf16.mxu0 %v4236_v51  ;;  %2915 = vmatprep.subr.bf16.mxu1 %v4239_v52  ;;  %v4314_v51 = vld [vmem:[#allocation4 + $0x204] ss:$16 sps:$4 sm:$0xff]   ;;  %v4317_v52 = vld [vmem:[#allocation4 + $0x20c] ss:$16 sps:$4 sm:$0xff]  }
 0x327   :  { %2859 = vmatprep.mubr.bf16.mxu0 %v2034_v54  ;;  %2941 = vmatprep.mubr.bf16.mxu1 %v2034_v54  ;;  %v2032_v54 = vmul.f32 %v4859_v45, %v4795_v53  ;;  %v4329_v53 = vld [vmem:[#allocation4 + $0x24c] ss:$16 sps:$4 sm:$0xff]  }
 0x329   :  { %2834 = vmatpush1.bf16.msra.mxu0 %v4234_v55  ;;  %2916 = vmatpush1.bf16.msra.mxu1 %v4237_v56  ;;  %v4312_v55 = vld [vmem:[#allocation4 + $0x200] ss:$16 sps:$4 sm:$0xff]   ;;  %v2033_v56 = vpack.c.bf16 %v2029_v50, %v2029_v50  ;;  %v4392_v50 = vld [vmem:[#allocation4 + $0x3a4] ss:$16 sps:$4 sm:$0xff]  }
 0x32a   :  { %2835 = vmatprep.subr.bf16.mxu0 %v4242_v57  ;;  %2917 = vmatprep.subr.bf16.mxu1 %v4245_v58  ;;  %v4315_v57 = vld [vmem:[#allocation4 + $0x208] ss:$16 sps:$4 sm:$0xff]   ;;  %v2036_v58 = vpack.c.bf16 %v2032_v54, %v2032_v54 }
 0x32b   :  { %v4393_v54 = vld [vmem:[#allocation4 + $0x3a8] ss:$16 sps:$4 sm:$0xff]  }
 0x32d   :  { %2836 = vmatpush1.bf16.msra.mxu0 %v4240_v59  ;;  %2918 = vmatpush1.bf16.msra.mxu1 %v4243_v60  ;;  %v4320_v59 = vld [vmem:[#allocation4 + $0x224] ss:$16 sps:$4 sm:$0xff]   ;;  %v4323_v60 = vld [vmem:[#allocation4 + $0x22c] ss:$16 sps:$4 sm:$0xff]  }
 0x32e   :  { %2837 = vmatprep.subr.bf16.mxu0 %v4248_v48  ;;  %2919 = vmatprep.subr.bf16.mxu1 %v4251_v61  ;;  %v4321_v48 = vld [vmem:[#allocation4 + $0x228] ss:$16 sps:$4 sm:$0xff]   ;;  %v4326_v61 = vld [vmem:[#allocation4 + $0x244] ss:$16 sps:$4 sm:$0xff]  }
 0x331   :  { %2838 = vmatpush1.bf16.msra.mxu0 %v4246_v62  ;;  %2920 = vmatpush1.bf16.msra.mxu1 %v4249_v63  ;;  %v4324_v62 = vld [vmem:[#allocation4 + $0x240] ss:$16 sps:$4 sm:$0xff]   ;;  %v4327_v63 = vld [vmem:[#allocation4 + $0x248] ss:$16 sps:$4 sm:$0xff]  }
 0x332   :  { %2839 = vmatprep.subr.bf16.mxu0 %v4254_v0  ;;  %2921 = vmatprep.subr.bf16.mxu1 %v4257_v1  ;;  %v4332_v0 = vld [vmem:[#allocation4 + $0x264] ss:$16 sps:$4 sm:$0xff]   ;;  %v4335_v1 = vld [vmem:[#allocation4 + $0x26c] ss:$16 sps:$4 sm:$0xff]  }
 0x335   :  { %2840 = vmatpush1.bf16.msra.mxu0 %v4252_v2  ;;  %2922 = vmatpush1.bf16.msra.mxu1 %v4255_v3  ;;  %v4330_v2 = vld [vmem:[#allocation4 + $0x260] ss:$16 sps:$4 sm:$0xff]   ;;  %v4333_v3 = vld [vmem:[#allocation4 + $0x268] ss:$16 sps:$4 sm:$0xff]  }
 0x336   :  { %2841 = vmatprep.subr.bf16.mxu0 %v4260_v4  ;;  %2923 = vmatprep.subr.bf16.mxu1 %v4263_v5  ;;  %v4338_v4 = vld [vmem:[#allocation4 + $0x284] ss:$16 sps:$4 sm:$0xff]   ;;  %v4341_v5 = vld [vmem:[#allocation4 + $0x28c] ss:$16 sps:$4 sm:$0xff]  }
 0x339   :  { %2842 = vmatpush1.bf16.msra.mxu0 %v4258_v6  ;;  %2924 = vmatpush1.bf16.msra.mxu1 %v4261_v7  ;;  %v4336_v6 = vld [vmem:[#allocation4 + $0x280] ss:$16 sps:$4 sm:$0xff]   ;;  %v4339_v7 = vld [vmem:[#allocation4 + $0x288] ss:$16 sps:$4 sm:$0xff]  }
 0x33a   :  { %2843 = vmatprep.subr.bf16.mxu0 %v4266_v8  ;;  %2925 = vmatprep.subr.bf16.mxu1 %v4269_v9  ;;  %v4344_v8 = vld [vmem:[#allocation4 + $0x2a4] ss:$16 sps:$4 sm:$0xff]   ;;  %v4347_v9 = vld [vmem:[#allocation4 + $0x2ac] ss:$16 sps:$4 sm:$0xff]  }
 0x33d   :  { %2844 = vmatpush1.bf16.msra.mxu0 %v4264_v10  ;;  %2926 = vmatpush1.bf16.msra.mxu1 %v4267_v11  ;;  %v4342_v10 = vld [vmem:[#allocation4 + $0x2a0] ss:$16 sps:$4 sm:$0xff]   ;;  %v4345_v11 = vld [vmem:[#allocation4 + $0x2a8] ss:$16 sps:$4 sm:$0xff]  }
 0x33e   :  { %2845 = vmatprep.subr.bf16.mxu0 %v4272_v12  ;;  %2927 = vmatprep.subr.bf16.mxu1 %v4275_v16  ;;  %v4350_v12 = vld [vmem:[#allocation4 + $0x2c4] ss:$16 sps:$4 sm:$0xff]   ;;  %v4353_v16 = vld [vmem:[#allocation4 + $0x2cc] ss:$16 sps:$4 sm:$0xff]  }
 0x341   :  { %2846 = vmatpush1.bf16.msra.mxu0 %v4270_v19  ;;  %2928 = vmatpush1.bf16.msra.mxu1 %v4273_v20  ;;  %v4348_v19 = vld [vmem:[#allocation4 + $0x2c0] ss:$16 sps:$4 sm:$0xff]   ;;  %v4351_v20 = vld [vmem:[#allocation4 + $0x2c8] ss:$16 sps:$4 sm:$0xff]  }
 0x342   :  { %2847 = vmatprep.subr.bf16.mxu0 %v4278_v21  ;;  %2929 = vmatprep.subr.bf16.mxu1 %v4281_v22  ;;  %v4356_v21 = vld [vmem:[#allocation4 + $0x2e4] ss:$16 sps:$4 sm:$0xff]   ;;  %v4359_v22 = vld [vmem:[#allocation4 + $0x2ec] ss:$16 sps:$4 sm:$0xff]  }
 0x345   :  { %2848 = vmatpush1.bf16.msra.mxu0 %v4276_v23  ;;  %2930 = vmatpush1.bf16.msra.mxu1 %v4279_v24  ;;  %v4354_v23 = vld [vmem:[#allocation4 + $0x2e0] ss:$16 sps:$4 sm:$0xff]   ;;  %v4357_v24 = vld [vmem:[#allocation4 + $0x2e8] ss:$16 sps:$4 sm:$0xff]  }
 0x346   :  { %2849 = vmatprep.subr.bf16.mxu0 %v4284_v25  ;;  %2931 = vmatprep.subr.bf16.mxu1 %v4287_v28  ;;  %v4362_v25 = vld [vmem:[#allocation4 + $0x304] ss:$16 sps:$4 sm:$0xff]   ;;  %v4365_v28 = vld [vmem:[#allocation4 + $0x30c] ss:$16 sps:$4 sm:$0xff]  }
 0x349   :  { %2850 = vmatpush1.bf16.msra.mxu0 %v4282_v29  ;;  %2932 = vmatpush1.bf16.msra.mxu1 %v4285_v32  ;;  %v4360_v29 = vld [vmem:[#allocation4 + $0x300] ss:$16 sps:$4 sm:$0xff]   ;;  %v4363_v32 = vld [vmem:[#allocation4 + $0x308] ss:$16 sps:$4 sm:$0xff]  }
 0x34a   :  { %2851 = vmatprep.subr.bf16.mxu0 %v4290_v33  ;;  %2933 = vmatprep.subr.bf16.mxu1 %v4293_v35  ;;  %v4368_v33 = vld [vmem:[#allocation4 + $0x324] ss:$16 sps:$4 sm:$0xff]   ;;  %v4371_v35 = vld [vmem:[#allocation4 + $0x32c] ss:$16 sps:$4 sm:$0xff]  }
 0x34d   :  { %2852 = vmatpush1.bf16.msra.mxu0 %v4288_v36  ;;  %2934 = vmatpush1.bf16.msra.mxu1 %v4291_v40  ;;  %v4366_v36 = vld [vmem:[#allocation4 + $0x320] ss:$16 sps:$4 sm:$0xff]   ;;  %v4369_v40 = vld [vmem:[#allocation4 + $0x328] ss:$16 sps:$4 sm:$0xff]  }
 0x34e   :  { %2853 = vmatprep.subr.bf16.mxu0 %v4296_v41  ;;  %2935 = vmatprep.subr.bf16.mxu1 %v4299_v42  ;;  %v4374_v41 = vld [vmem:[#allocation4 + $0x344] ss:$16 sps:$4 sm:$0xff]   ;;  %v4377_v42 = vld [vmem:[#allocation4 + $0x34c] ss:$16 sps:$4 sm:$0xff]  }
 0x351   :  { %2854 = vmatpush1.bf16.msra.mxu0 %v4294_v26  ;;  %2936 = vmatpush1.bf16.msra.mxu1 %v4297_v30  ;;  %v4372_v26 = vld [vmem:[#allocation4 + $0x340] ss:$16 sps:$4 sm:$0xff]   ;;  %v4375_v30 = vld [vmem:[#allocation4 + $0x348] ss:$16 sps:$4 sm:$0xff]  }
 0x352   :  { %2855 = vmatprep.subr.bf16.mxu0 %v4302_v27  ;;  %2937 = vmatprep.subr.bf16.mxu1 %v4305_v44  ;;  %v4380_v27 = vld [vmem:[#allocation4 + $0x364] ss:$16 sps:$4 sm:$0xff]   ;;  %v4383_v44 = vld [vmem:[#allocation4 + $0x36c] ss:$16 sps:$4 sm:$0xff]  }
 0x355   :  { %2856 = vmatpush1.bf16.msra.mxu0 %v4300_v38  ;;  %2938 = vmatpush1.bf16.msra.mxu1 %v4303_v43  ;;  %v4378_v38 = vld [vmem:[#allocation4 + $0x360] ss:$16 sps:$4 sm:$0xff]   ;;  %v4381_v43 = vld [vmem:[#allocation4 + $0x368] ss:$16 sps:$4 sm:$0xff]  }
 0x356   :  { %2857 = vmatprep.subr.bf16.mxu0 %v4308_v37  ;;  %2939 = vmatprep.subr.bf16.mxu1 %v4311_v39  ;;  %v4386_v37 = vld [vmem:[#allocation4 + $0x384] ss:$16 sps:$4 sm:$0xff]   ;;  %v4389_v39 = vld [vmem:[#allocation4 + $0x38c] ss:$16 sps:$4 sm:$0xff]  }
 0x359   :  { %2858 = vmatpush1.bf16.msra.mxu0 %v4306_v31  ;;  %2940 = vmatpush1.bf16.msra.mxu1 %v4309_v46  ;;  %v4384_v31 = vld [vmem:[#allocation4 + $0x380] ss:$16 sps:$4 sm:$0xff]   ;;  %v4387_v46 = vld [vmem:[#allocation4 + $0x388] ss:$16 sps:$4 sm:$0xff]  }
 0x35a   :  { %2868 = vmatprep.subr.bf16.mxu0 %v4314_v51  ;;  %2950 = vmatprep.subr.bf16.mxu1 %v4317_v52  ;;  %v4395_v51 = vld [vmem:[#allocation4 + $0x3ac] ss:$16 sps:$4 sm:$0xff]   ;;  %v4390_v52 = vld [vmem:[#allocation4 + $0x3a0] ss:$16 sps:$4 sm:$0xff]  }
 0x35c   :  { %2860 = vmatmul.mubr.bf16.vlgmr.msra.gmra.mrb[8].mxu0 %v2033_v56  ;;  %2942 = vmatmul.mubr.bf16.vlgmr.msra.gmra.mrb[8].mxu1 %v2033_v56  ;;  %v4401_v56 = vld [vmem:[#allocation4 + $0x3cc] ss:$16 sps:$4 sm:$0xff]  }
 0x35d   :  { %2869 = vmatpush1.bf16.msra.mxu0 %v4312_v55  ;;  %2900 = vmatprep.mubr.bf16.mxu0 %v2036_v58  ;;  %v4398_v55 = vld [vmem:[#allocation4 + $0x3c4] ss:$16 sps:$4 sm:$0xff]  }
 0x35e   :  { %2951 = vmatpush1.bf16.msra.mxu1 %v4315_v57  ;;  %2982 = vmatprep.mubr.bf16.mxu1 %v2036_v58  ;;  %v4396_v57 = vld [vmem:[#allocation4 + $0x3c0] ss:$16 sps:$4 sm:$0xff]   ;;  %v4399_v58 = vld [vmem:[#allocation4 + $0x3c8] ss:$16 sps:$4 sm:$0xff]  }
 0x35f   :  { %2870 = vmatprep.subr.bf16.mxu0 %v4320_v59  ;;  %2952 = vmatprep.subr.bf16.mxu1 %v4323_v60  ;;  %v4404_v59 = vld [vmem:[#allocation4 + $0x3e4] ss:$16 sps:$4 sm:$0xff]   ;;  %v4407_v60 = vld [vmem:[#allocation4 + $0x3ec] ss:$16 sps:$4 sm:$0xff]  }
 0x361   :  { %2871 = vmatpush1.bf16.msra.mxu0 %v4318_v47  ;;  %v4402_v47 = vld [vmem:[#allocation4 + $0x3e0] ss:$16 sps:$4 sm:$0xff]  }
 0x362   :  { %2953 = vmatpush1.bf16.msra.mxu1 %v4321_v48  ;;  %2872 = vmatprep.subr.bf16.mxu0 %v4326_v61  ;;  %v4405_v48 = vld [vmem:[#allocation4 + $0x3e8] ss:$16 sps:$4 sm:$0xff]   ;;  %v2031_v61 = vmul.f32 %v4859_v45, %v4787_v49 }
 0x363   :  { %2954 = vmatprep.subr.bf16.mxu1 %v4329_v53 }
 0x364   :  { %v2035_v53 = vpack.c.bf16 %v2031_v61, %v2031_v61  ;;  %v4421_v61 = vld [vmem:[#allocation6 + $0xd8] sm:$0xff]  }
 0x365   :  { %2873 = vmatpush1.bf16.msra.mxu0 %v4324_v62 }
 0x366   :  { %2955 = vmatpush1.bf16.msra.mxu1 %v4327_v63  ;;  %2874 = vmatprep.subr.bf16.mxu0 %v4332_v0  ;;  %v3575_v0 = vld [vmem:[%s4900_s4] ss:$0 sm:$0xff] }
 0x367   :  { %2956 = vmatprep.subr.bf16.mxu1 %v4335_v1 }
 0x369   :  { %2875 = vmatpush1.bf16.msra.mxu0 %v4330_v2 }
 0x36a   :  { %2957 = vmatpush1.bf16.msra.mxu1 %v4333_v3  ;;  %2876 = vmatprep.subr.bf16.mxu0 %v4338_v4 }
 0x36b   :  { %2958 = vmatprep.subr.bf16.mxu1 %v4341_v5 }
 0x36d   :  { %2877 = vmatpush1.bf16.msra.mxu0 %v4336_v6 }
 0x36e   :  { %2959 = vmatpush1.bf16.msra.mxu1 %v4339_v7  ;;  %2878 = vmatprep.subr.bf16.mxu0 %v4344_v8 }
 0x36f   :  { %2960 = vmatprep.subr.bf16.mxu1 %v4347_v9  ;;  %v2165_v9 = vld [vmem:[%s4902_s6] sm:$0xf] }
 0x371   :  { %2879 = vmatpush1.bf16.msra.mxu0 %v4342_v10  ;;  %v2170_v10 = vrot.slane %v2165_v9, %v293_v14 }
 0x372   :  { %2961 = vmatpush1.bf16.msra.mxu1 %v4345_v11  ;;  %2880 = vmatprep.subr.bf16.mxu0 %v4350_v12  ;;  %v2174_v11 = vrot.slane %v2165_v9, %v297_v17  ;;  %v2182_v12 = vrot.slane %v2165_v9, %v305_v18 }
 0x373   :  { %2962 = vmatprep.subr.bf16.mxu1 %v4353_v16 }
 0x375   :  { %2881 = vmatpush1.bf16.msra.mxu0 %v4348_v19  ;;  %v2178_v19 = vrot.slane %v2165_v9, %v301_v15  ;;  %v4409_v15 = vld [vmem:[#allocation6 + $0xc0] sm:$0xff]   ;;  %v4437_v9 = vld [vmem:[#allocation6 + $0xf8] sm:$0xff]  }
 0x376   :  { %2963 = vmatpush1.bf16.msra.mxu1 %v4351_v20  ;;  %2882 = vmatprep.subr.bf16.mxu0 %v4356_v21 }
 0x377   :  { %2964 = vmatprep.subr.bf16.mxu1 %v4359_v22 }
 0x379   :  { %2883 = vmatpush1.bf16.msra.mxu0 %v4354_v23 }
 0x37a   :  { %2965 = vmatpush1.bf16.msra.mxu1 %v4357_v24  ;;  %2884 = vmatprep.subr.bf16.mxu0 %v4362_v25 }
 0x37b   :  { %2966 = vmatprep.subr.bf16.mxu1 %v4365_v28 }
 0x37d   :  { %2885 = vmatpush1.bf16.msra.mxu0 %v4360_v29 }
 0x37e   :  { %2967 = vmatpush1.bf16.msra.mxu1 %v4363_v32  ;;  %2886 = vmatprep.subr.bf16.mxu0 %v4368_v33 }
 0x37f   :  { %2968 = vmatprep.subr.bf16.mxu1 %v4371_v35 }
 0x381   :  { %2887 = vmatpush1.bf16.msra.mxu0 %v4366_v36 }
 0x382   :  { %2969 = vmatpush1.bf16.msra.mxu1 %v4369_v40  ;;  %2888 = vmatprep.subr.bf16.mxu0 %v4374_v41  ;;  %v4410_v40 = vld [vmem:[#allocation6] sm:$0xff]  }
 0x383   :  { %2970 = vmatprep.subr.bf16.mxu1 %v4377_v42  ;;  %v4411_v41 = vld [vmem:[#allocation6 + $0x80] sm:$0xff]   ;;  %v4412_v42 = vld [vmem:[#allocation6 + $0x48] sm:$0xff]  }
 0x385   :  { %2889 = vmatpush1.bf16.msra.mxu0 %v4372_v26  ;;  %v4413_v26 = vld [vmem:[#allocation6 + $0xc8] sm:$0xff]  }
 0x386   :  { %2971 = vmatpush1.bf16.msra.mxu1 %v4375_v30  ;;  %2890 = vmatprep.subr.bf16.mxu0 %v4380_v27  ;;  %v4414_v30 = vld [vmem:[#allocation6 + $0x8] sm:$0xff]  }
 0x387   :  { %2972 = vmatprep.subr.bf16.mxu1 %v4383_v44  ;;  %v4415_v27 = vld [vmem:[#allocation6 + $0x88] sm:$0xff]   ;;  %v4416_v44 = vld [vmem:[#allocation6 + $0x50] sm:$0xff]  }
 0x389   :  { %2891 = vmatpush1.bf16.msra.mxu0 %v4378_v38  ;;  %v4417_v38 = vld [vmem:[#allocation6 + $0xd0] sm:$0xff]  }
 0x38a   :  { %2973 = vmatpush1.bf16.msra.mxu1 %v4381_v43  ;;  %2892 = vmatprep.subr.bf16.mxu0 %v4386_v37  ;;  %v4418_v43 = vld [vmem:[#allocation6 + $0x10] sm:$0xff]  }
 0x38b   :  { %2974 = vmatprep.subr.bf16.mxu1 %v4389_v39  ;;  %v4419_v37 = vld [vmem:[#allocation6 + $0x90] sm:$0xff]  }
 0x38d   :  { %2893 = vmatpush1.bf16.msra.mxu0 %v4384_v31 }
 0x38e   :  { %2975 = vmatpush1.bf16.msra.mxu1 %v4387_v46  ;;  %2894 = vmatprep.subr.bf16.mxu0 %v4392_v50 }
 0x38f   :  { %2976 = vmatprep.subr.bf16.mxu1 %v4395_v51 }
 0x391   :  { %2895 = vmatpush1.bf16.msra.mxu0 %v4390_v52 }
 0x392   :  { %2977 = vmatpush1.bf16.msra.mxu1 %v4393_v54  ;;  %2896 = vmatprep.subr.bf16.mxu0 %v4398_v55 }
 0x393   :  { %2978 = vmatprep.subr.bf16.mxu1 %v4401_v56 }
 0x395   :  { %2897 = vmatpush1.bf16.msra.mxu0 %v4396_v57 }
 0x396   :  { %2979 = vmatpush1.bf16.msra.mxu1 %v4399_v58  ;;  %2898 = vmatprep.subr.bf16.mxu0 %v4404_v59 }
 0x397   :  { %2980 = vmatprep.subr.bf16.mxu1 %v4407_v60 }
 0x399   :  { %2899 = vmatpush1.bf16.msra.mxu0 %v4402_v47 }
 0x39a   :  { %2981 = vmatpush1.bf16.msra.mxu1 %v4405_v48  ;;  %3813 = vmatprep.subr.bf16.mxu0 %v4408_v13  ;;  %v4420_v48 = vld [vmem:[#allocation6 + $0x58] sm:$0xff]  }
 0x39b   :  { %3835 = vmatprep.subr.bf16.mxu1 %v4409_v15 }
 0x39c   :  { %2901 = vmatmul.mubr.bf16.vlgmr.msra.gmra.mrb[8].mxu0 %v2035_v53 }
 0x39d   :  { %2983 = vmatmul.mubr.bf16.vlgmr.msra.gmra.mrb[8].mxu1 %v2035_v53  ;;  %3814 = vmatpush3.bf16.msra.mxu0 %v4410_v40  ;;  %v4422_v53 = vld [vmem:[#allocation6 + $0x18] sm:$0xff]  }
 0x39e   :  { %3836 = vmatpush3.bf16.msra.mxu1 %v4411_v41  ;;  %3815 = vmatprep.subr.bf16.mxu0 %v4412_v42 }
 0x39f   :  { %3837 = vmatprep.subr.bf16.mxu1 %v4413_v26 }
 0x3a1   :  { %3816 = vmatpush3.bf16.msra.mxu0 %v4414_v30 }
 0x3a2   :  { %3838 = vmatpush3.bf16.msra.mxu1 %v4415_v27  ;;  %3817 = vmatprep.subr.bf16.mxu0 %v4416_v44 }
 0x3a3   :  { %3839 = vmatprep.subr.bf16.mxu1 %v4417_v38 }
 0x3a5   :  { %3818 = vmatpush3.bf16.msra.mxu0 %v4418_v43 }
 0x3a6   :  { %3840 = vmatpush3.bf16.msra.mxu1 %v4419_v37  ;;  %3819 = vmatprep.subr.bf16.mxu0 %v4420_v48 }
 0x3a7   :  { %3841 = vmatprep.subr.bf16.mxu1 %v4421_v61 }
 0x3a9   :  { %3820 = vmatpush3.bf16.msra.mxu0 %v4422_v53 }
 0x3ef   :  { %v3785_v62 = vpop.f32.mrb[4].mxu0  ;;  %v3807_v63 = vpop.f32.mrb[4].mxu1 }
 0x3f0   :  { %v3786_v1 = vpop.f32.mrb[5].mxu0  ;;  %v3808_v2 = vpop.f32.mrb[5].mxu1 }
 0x3f1   :  { %v3787_v3 = vadd.f32 %v3786_v1, %v3785_v62  ;;  %v3809_v4 = vadd.f32 %v3808_v2, %v3807_v63  ;;  %v3788_v5 = vpop.f32.mrb[6].mxu0  ;;  %v3810_v6 = vpop.f32.mrb[6].mxu1  ;;  %v4423_v62 = vld [vmem:[#allocation6 + $0x98] sm:$0xff]   ;;  %v4424_v63 = vld [vmem:[#allocation6 + $0x60] sm:$0xff]  }
 0x3f2   :  { %v3789_v7 = vpop.f32.mrb[7].mxu0  ;;  %v3811_v49 = vpop.f32.mrb[7].mxu1  ;;  %3842 = vmatpush3.bf16.msra.mxu1 %v4423_v62  ;;  %v4426_v1 = vld [vmem:[#allocation6 + $0x20] sm:$0xff]   ;;  %3821 = vmatprep.subr.bf16.mxu0 %v4424_v63  ;;  %v4431_v5 = vld [vmem:[#allocation6 + $0xa8] sm:$0xff]   ;;  %v4432_v6 = vld [vmem:[#allocation6 + $0x70] sm:$0xff]  }
 0x3f3   :  { %v1861_v45 = vadd.f32 %v3787_v3, %v3575_v0  ;;  %v4425_v0 = vld [vmem:[#allocation6 + $0xe0] sm:$0xff]   ;;  %v4429_v3 = vld [vmem:[#allocation6 + $0xe8] sm:$0xff]   ;;  %3822 = vmatpush3.bf16.msra.mxu0 %v4426_v1  ;;  %v4433_v7 = vld [vmem:[#allocation6 + $0xf0] sm:$0xff]  }
 0x3f4   :  { %v4427_v2 = vld [vmem:[#allocation6 + $0xa0] sm:$0xff]   ;;  %3843 = vmatprep.subr.bf16.mxu1 %v4425_v0  ;;  %3823 = vmatprep.subr.bf16.mxu0 %v4428_v34  ;;  %v4434_v49 = vld [vmem:[#allocation6 + $0x30] sm:$0xff]  }
 0x3f5   :  { %v1901_v8 = vadd.f32 %v3809_v4, %v1861_v45  ;;  %v4430_v4 = vld [vmem:[#allocation6 + $0x28] sm:$0xff]   ;;  %v4435_v45 = vld [vmem:[#allocation6 + $0xb0] sm:$0xff]  }
 0x3f6   :  { %3844 = vmatpush3.bf16.msra.mxu1 %v4427_v2 }
 0x3f7   :  { %1906 = vst [vmem:[%s4905_s9] sm:$0xff] %v1901_v8  ;;  %3845 = vmatprep.subr.bf16.mxu1 %v4429_v3  ;;  %3824 = vmatpush3.bf16.msra.mxu0 %v4430_v4  ;;  %v4436_v8 = vld [vmem:[#allocation6 + $0x78] sm:$0xff]  }
 0x3f8   :  { %3825 = vmatprep.subr.bf16.mxu0 %v4432_v6 }
 0x3fa   :  { %3846 = vmatpush3.bf16.msra.mxu1 %v4431_v5 }
 0x3fb   :  { %3847 = vmatprep.subr.bf16.mxu1 %v4433_v7  ;;  %3826 = vmatpush3.bf16.msra.mxu0 %v4434_v49 }
 0x3fc   :  { %3827 = vmatprep.subr.bf16.mxu0 %v4436_v8 }
 0x3fe   :  { %3848 = vmatpush3.bf16.msra.mxu1 %v4435_v45 }
 0x3ff   :  { %3849 = vmatprep.subr.bf16.mxu1 %v4437_v9 }
 0x46f   :  { %v2902_v16 = vpop.f32.mrb[8].mxu0 }
 0x470   :  { %v3861_v20 = vadd.f32 %v2902_v16, %v2170_v10  ;;  %v2984_v21 = vpop.f32.mrb[8].mxu1  ;;  %v2904_v22 = vpop.f32.mrb[9].mxu0  ;;  %v4438_v10 = vld [vmem:[#allocation6 + $0x38] sm:$0xff]  }
 0x471   :  { %v3862_v23 = vadd.f32 %v2904_v22, %v2174_v11  ;;  %v2986_v24 = vpop.f32.mrb[9].mxu1  ;;  %v2906_v25 = vpop.f32.mrb[10].mxu0  ;;  %v3863_v14 = vadd.f32 %v2984_v21, %v2178_v19  ;;  %v4439_v11 = vld [vmem:[#allocation6 + $0xb8] sm:$0xff]   ;;  %3828 = vmatpush3.bf16.msra.mxu0 %v4438_v10 }
 0x472   :  { %v3864_v28 = vadd.f32 %v2986_v24, %v2182_v12  ;;  %v2988_v29 = vpop.f32.mrb[10].mxu1  ;;  %v2907_v32 = vpop.f32.mrb[11].mxu0  ;;  %3850 = vmatpush3.bf16.msra.mxu1 %v4439_v11 }
 0x473   :  { %v2995_v33 = vadd.f32 %v3862_v23, %v3861_v20  ;;  %v2989_v35 = vpop.f32.mrb[11].mxu1 }
 0x474   :  { %v2994_v18 = vsel %vm84_vm3, %v3864_v28, 0.0  ;;  %v3736_v35 = vld [vmem:[%s4904_s8] ss:$0 sm:$0xff] }
 0x475   :  { %v2996_v17 = vadd.f32 %v3863_v14, %v2995_v33 }
 0x477   :  { %v2997_v36 = vadd.f32 %v2996_v17, %v2994_v18 }
 0x479   :  { %2998 = vadd.xlane.f32.xlu0 %v2997_v36 }
 0x506   :  { %v2999_v39 = vpop.xlane.xlu0 %2998 }
 0x507   :  { %v3000_v31 = vmul.f32 0.0025, %v2999_v39 }
 0x509   :  { %v3001_v46 = vsub.f32 %v3861_v20, %v3000_v31  ;;  %v3002_v50 = vsub.f32 %v3862_v23, %v3000_v31  ;;  %v3003_v51 = vsub.f32 %v3863_v14, %v3000_v31  ;;  %v3004_v52 = vsub.f32 %v3864_v28, %v3000_v31 }
 0x50b   :  { %v3009_v54 = vmul.f32 %v3001_v46, %v3001_v46  ;;  %v3010_v55 = vmul.f32 %v3002_v50, %v3002_v50  ;;  %v3008_v56 = vsel %vm84_vm3, %v3004_v52, 0.0  ;;  %v3011_v57 = vmul.f32 %v3003_v51, %v3003_v51 }
 0x50c   :  { %v3012_v59 = vmul.f32 %v3008_v56, %v3008_v56 }
 0x50d   :  { %v3013_v58 = vadd.f32 %v3010_v55, %v3009_v54 }
 0x50f   :  { %v3014_v60 = vadd.f32 %v3013_v58, %v3011_v57 }
 0x511   :  { %v3015_v47 = vadd.f32 %v3014_v60, %v3012_v59 }
 0x513   :  { %3016 = vadd.xlane.f32.xlu1 %v3015_v47 }
 0x5a0   :  { %v3017_v12 = vpop.xlane.xlu1 %3016 }
 0x5a1   :  { %v3018_v16 = vmul.f32 0.0025, %v3017_v12 }
 0x5a3   :  { %v3019_v19 = vadd.f32 1e-05, %v3018_v16 }
 0x5a5   :  { %4444 = vrsqrt.f32 %v3019_v19 }
 0x5af   :  { %v4445_v20 = vpop.eup %4444 }
 0x5b0   :  { %v3022_v21 = vmul.f32 %v4445_v20, %v3002_v50  ;;  %v3024_v22 = vmul.f32 %v4445_v20, %v3008_v56  ;;  %v3021_v23 = vmul.f32 %v4445_v20, %v3001_v46  ;;  %v3023_v24 = vmul.f32 %v4445_v20, %v3003_v51 }
 0x5b2   :  { %v3026_v25 = vpack.c.bf16 %v3022_v21, %v3022_v21  ;;  %v3028_v28 = vpack.c.bf16 %v3024_v22, %v3024_v22  ;;  %v3025_v29 = vpack.c.bf16 %v3021_v23, %v3021_v23  ;;  %v3027_v32 = vpack.c.bf16 %v3023_v24, %v3023_v24 }
 0x5b4   :  { %3324 = vmatprep.mubr.bf16.mxu0 %v3026_v25  ;;  %3364 = vmatprep.mubr.bf16.mxu1 %v3028_v28 }
 0x5b5   :  { %3325 = vmatmul.mubr.bf16.vlgmr.msra.gmra.mrb[12].mxu0 %v3025_v29  ;;  %3365 = vmatmul.mubr.bf16.vlgmr.msra.gmra.mrb[12].mxu1 %v3027_v32 }
 0x688   :  { %v3829_v14 = vpop.f32.mrb[12].mxu0  ;;  %v3851_v33 = vpop.f32.mrb[12].mxu1 }
 0x689   :  { %v3830_v17 = vpop.f32.mrb[13].mxu0  ;;  %v3852_v18 = vpop.f32.mrb[13].mxu1 }
 0x68a   :  { %v3831_v36 = vadd.f32 %v3830_v17, %v3829_v14  ;;  %v3853_v13 = vadd.f32 %v3852_v18, %v3851_v33  ;;  %v3832_v15 = vpop.f32.mrb[14].mxu0  ;;  %v3854_v40 = vpop.f32.mrb[14].mxu1 }
 0x68b   :  { %v3833_v41 = vpop.f32.mrb[15].mxu0  ;;  %v3855_v42 = vpop.f32.mrb[15].mxu1 }
 0x68c   :  { %v3327_v26 = vadd.f32 %v3831_v36, %v3736_v35 }
 0x68e   :  { %v3367_v30 = vadd.f32 %v3853_v13, %v3327_v26 }
 0x690   :  { %3372 = vst [vmem:[%s4906_s10] sm:$0xff] %v3367_v30 }
 0x691   :  { %3381 = vsyncpa [#allocation3], 1 }
 0x692   :  { %3382 = vsyncpa [#allocation5], 1 }

</bundles_post_ra>
